<compile_context>
chip_gen: v7x
topology: tpu7x:2x2x1
jax: 0.10.0
libtpu: 0.0.40
codegen_flags: <defaults>
</compile_context>

<pallas_src>
import functools
import math

import jax
import jax.numpy as jnp
from jax.experimental import pallas as pl
from jax.experimental.pallas import tpu as pltpu


def _round_up(x, m):
    return ((x + m - 1) // m) * m


def _pick_vmem_limit():
    """Generation-aware scoped-VMEM budget (v7x: 64 MiB physical; v5e/v6e: 128)."""
    cap = None
    try:
        info = pltpu.get_tpu_info()
        for attr in ("vmem_capacity_bytes", "vmem_bytes", "vmem_size_bytes"):
            cap = getattr(info, attr, None)
            if cap:
                break
    except Exception:
        cap = None
    if not cap:
        cap = 128 * 1024 * 1024
    if cap <= 64 * 1024 * 1024:
        return 40 * 1024 * 1024          # v7x: leave headroom under 64 MiB/TC
    return 96 * 1024 * 1024              # v5e / v6e: 128 MiB physical


_VMEM_LIMIT_BYTES = _pick_vmem_limit()


# ----------------------------------------------------------------------------
# Kernel 1: batched EMA update over all parameter leaves (one pallas_call)
#   k <- k + (1 - m) * (q - k)     (== m*k + (1-m)*q, robust form)
#   f32 master aliased in place + bf16 shadow emitted for the forward kernel.
# ----------------------------------------------------------------------------
def _ema_kernel(m_ref, *refs, n_leaves):
    # refs = q[0:n], k[n:2n], out_f32[2n:3n] (aliased onto k), out_bf16[3n:4n]
    m = m_ref[0]
    one_minus_m = 1.0 - m
    for i in range(n_leaves):
        q = refs[i][...]
        k = refs[n_leaves + i][...]
        new_k = k + one_minus_m * (q - k)
        refs[2 * n_leaves + i][...] = new_k
        refs[3 * n_leaves + i][...] = new_k.astype(jnp.bfloat16)


def ema_update_all(student, teacher, m):
    """EMA for every parameter leaf in ONE pallas_call (no per-leaf dispatch).

    Returns (new_teacher_f32 in original shapes, bf16 2-D shadows per leaf).
    The f32 outputs alias the teacher input buffers; under jit with donated
    teacher leaves this is a true in-place HBM update.
    """
    names = sorted(student.keys())
    n = len(names)
    q2, k2, shapes = [], [], []
    for name in names:
        q, k = student[name], teacher[name]
        shapes.append(q.shape)
        if q.ndim >= 2:
            q2.append(q.reshape(-1, q.shape[-1]))
            k2.append(k.reshape(-1, k.shape[-1]))
        else:
            q2.append(q.reshape(1, -1))
            k2.append(k.reshape(1, -1))
    # TODO(synk): leaves bigger than ~VMEM/4 need a cdiv-masked row grid with
    # 4-8 MiB blocks; MLP-sized leaves fit as whole-array VMEM blocks.
    m_arr = jnp.asarray(m, jnp.float32).reshape(1)
    vmem = pl.BlockSpec(memory_space=pltpu.MemorySpace.VMEM)
    outs = pl.pallas_call(
        functools.partial(_ema_kernel, n_leaves=n),
        out_shape=tuple(jax.ShapeDtypeStruct(a.shape, a.dtype) for a in k2)
        + tuple(jax.ShapeDtypeStruct(a.shape, jnp.bfloat16) for a in k2),
        in_specs=[pl.BlockSpec(memory_space=pltpu.MemorySpace.SMEM)]
        + [vmem] * (2 * n),
        out_specs=tuple([vmem] * (2 * n)),
        input_output_aliases={1 + n + i: i for i in range(n)},
        compiler_params=pltpu.CompilerParams(
            vmem_limit_bytes=_VMEM_LIMIT_BYTES),
    )(m_arr, *q2, *k2)
    new_f32 = {name: outs[i].reshape(shapes[i]) for i, name in enumerate(names)}
    bf16_2d = {name: outs[n + i] for i, name in enumerate(names)}
    return new_f32, bf16_2d


# ----------------------------------------------------------------------------
# Kernel 2: fused student + teacher MLP forward (first layer concatenated)
# ----------------------------------------------------------------------------
def _mlp_pair_kernel(x_ref, w1_ref, b1_ref, w2s_ref, b2s_ref, w2t_ref, b2t_ref,
                     os_ref, ot_ref):
    x = x_ref[...].astype(jnp.bfloat16)               # cast in VMEM, no wrapper pass
    # One MXU pass of x over the concatenated (D, 2H) first-layer weights.
    h = jnp.dot(x, w1_ref[...], preferred_element_type=jnp.float32)   # [TM, 2H]
    h = jnp.maximum(h + b1_ref[...], 0.0).astype(jnp.bfloat16)
    H = w2s_ref.shape[0]
    ys = jnp.dot(h[:, :H], w2s_ref[...],
                 preferred_element_type=jnp.float32) + b2s_ref[...]
    yt = jnp.dot(h[:, H:], w2t_ref[...],
                 preferred_element_type=jnp.float32) + b2t_ref[...]
    os_ref[...] = ys.astype(os_ref.dtype)             # student: f32 (feeds loss)
    ot_ref[...] = yt.astype(ot_ref.dtype)             # teacher: bf16 (stop_grad)


def _mlp_single_kernel(x_ref, w1_ref, b1_ref, w2_ref, b2_ref, o_ref):
    x = x_ref[...].astype(jnp.bfloat16)
    h = jnp.dot(x, w1_ref[...], preferred_element_type=jnp.float32)
    h = jnp.maximum(h + b1_ref[...], 0.0).astype(jnp.bfloat16)
    y = jnp.dot(h, w2_ref[...], preferred_element_type=jnp.float32) + b2_ref[...]
    o_ref[...] = y.astype(o_ref.dtype)


def _choose_tm(M, tm=None):
    if tm is None:
        # v5e/v6e (128 MiB VMEM): bigger M tiles amortize per-step overhead;
        # v7x (64 MiB): stay smaller so resident weights + tiles still fit.
        tm = 512 if _VMEM_LIMIT_BYTES >= 64 * 1024 * 1024 else 256
    # At least 2 grid steps so ("parallel",) shards across both v7x TensorCores.
    half = _round_up(max(1, pl.cdiv(M, 2)), 8)
    return max(8, min(tm, half))


def mlp_pair_forward(x, sp, tp, tm=None):
    """Both MLPs on the same activations in one pallas_call.

    sp / tp: prepped params {"w1": bf16 (D,H), "b1": f32 (1,H),
                             "w2": bf16 (H,D), "b2": f32 (1,D)}.
    """
    B, S, D = x.shape
    H = sp["w1"].shape[1]
    assert D % 128 == 0 and H % 128 == 0, "keep feature dims lane-dense"
    M = B * S
    TM = _choose_tm(M, tm)
    x2d = x.reshape(M, D)                              # f32; no pad, cdiv grid masks

    # TODO(synk): for very large weights keep the student half pre-stored in a
    # persistent (D, 2H) buffer instead of concatenating every step.
    w1 = jnp.concatenate([sp["w1"], tp["w1"]], axis=1)   # (D, 2H) bf16
    b1 = jnp.concatenate([sp["b1"], tp["b1"]], axis=1)   # (1, 2H) f32

    def resident(shape):
        # TODO(synk): on v7x add pipeline_mode=pl.Buffered(1) here to halve the
        # resident-weight VMEM (constant index map, never re-fetched).
        return pl.BlockSpec(shape, lambda i: (0, 0))

    def row():
        return pl.BlockSpec((TM, D), lambda i: (i, 0))

    # TODO(synk): for D/H too large for resident weights, add a trailing
    # "arbitrary" reduction grid axis with an f32 accumulator scratch.
    ys, yt = pl.pallas_call(
        _mlp_pair_kernel,
        out_shape=(jax.ShapeDtypeStruct((M, D), jnp.float32),
                   jax.ShapeDtypeStruct((M, D), jnp.bfloat16)),
        grid=(pl.cdiv(M, TM),),
        in_specs=[row(),
                  resident((D, 2 * H)), resident((1, 2 * H)),
                  resident((H, D)), resident((1, D)),
                  resident((H, D)), resident((1, D))],
        out_specs=(row(), row()),
        compiler_params=pltpu.CompilerParams(
            dimension_semantics=("parallel",),
            vmem_limit_bytes=_VMEM_LIMIT_BYTES),
    )(x2d, w1, b1, sp["w2"], sp["b2"], tp["w2"], tp["b2"])
    return ys.reshape(B, S, D), yt.reshape(B, S, D)


def mlp_single_forward(x, p, out_dtype=jnp.float32, tm=None):
    """Single-network forward (used when student/teacher see different x)."""
    B, S, D = x.shape
    H = p["w1"].shape[1]
    assert D % 128 == 0 and H % 128 == 0
    M = B * S
    TM = _choose_tm(M, tm)
    x2d = x.reshape(M, D)

    def resident(shape):
        return pl.BlockSpec(shape, lambda i: (0, 0))

    def row():
        return pl.BlockSpec((TM, D), lambda i: (i, 0))

    y = pl.pallas_call(
        _mlp_single_kernel,
        out_shape=jax.ShapeDtypeStruct((M, D), out_dtype),
        grid=(pl.cdiv(M, TM),),
        in_specs=[row(), resident((D, H)), resident((1, H)),
                  resident((H, D)), resident((1, D))],
        out_specs=row(),
        compiler_params=pltpu.CompilerParams(
            dimension_semantics=("parallel",),
            vmem_limit_bytes=_VMEM_LIMIT_BYTES),
    )(x2d, p["w1"], p["b1"], p["w2"], p["b2"])
    return y.reshape(B, S, D)


# ----------------------------------------------------------------------------
# Schedule (deterministic stand-in for scheduling.HPScheduler)
# ----------------------------------------------------------------------------
def cosine_ema_schedule(step, base_m=0.996, total_steps=1000):
    frac = jnp.clip(jnp.asarray(step, jnp.float32) / total_steps, 0.0, 1.0)
    return 1.0 - (1.0 - base_m) * (jnp.cos(jnp.pi * frac) + 1.0) / 2.0


def _prep_params(p):
    """bf16 weights (MXU inputs) + f32 (1, N) biases for the forward kernels."""
    return {
        "w1": p["w1"].astype(jnp.bfloat16),
        "b1": p["b1"].reshape(1, -1).astype(jnp.float32),
        "w2": p["w2"].astype(jnp.bfloat16),
        "b2": p["b2"].reshape(1, -1).astype(jnp.float32),
    }


# ----------------------------------------------------------------------------
# EMASelfDistillation — JAX/Pallas port of the PyTorch module
# ----------------------------------------------------------------------------
class EMASelfDistillation:
    def __init__(self, student_params, schedule,
                 student_remapping=None, teacher_remapping=None):
        self.student_params = student_params
        # teacher = copy.deepcopy(student): identical initial parameters.
        self.teacher_params = jax.tree_util.tree_map(jnp.array, student_params)
        self.schedule = schedule
        self.student_remapping = student_remapping or {}
        self.teacher_remapping = teacher_remapping or {}
        self.training = True
        # Cached bf16 student weights (the student only changes via an external
        # optimizer step — refresh this cache whenever that happens).
        # TODO(synk): hook cache refresh into the student optimizer step.
        self._student_prepped = _prep_params(student_params)

        schedule_fn = schedule

        def step(x_s, x_t, student_f32, student_prepped, teacher_f32,
                 global_step, training, same_x):
            if training:
                m = schedule_fn(global_step)
                new_teacher, t_bf16 = ema_update_all(student_f32, teacher_f32, m)
                teacher_prepped = {
                    "w1": t_bf16["w1"],
                    "b1": new_teacher["b1"].reshape(1, -1).astype(jnp.float32),
                    "w2": t_bf16["w2"],
                    "b2": new_teacher["b2"].reshape(1, -1).astype(jnp.float32),
                }
            else:
                new_teacher = teacher_f32
                teacher_prepped = _prep_params(teacher_f32)
            if same_x:
                s_out, t_out = mlp_pair_forward(x_s, student_prepped,
                                                teacher_prepped)
            else:
                # Distinct remapped activations: true single-network kernels,
                # no duplicated matmuls / writeback.
                s_out = mlp_single_forward(x_s, student_prepped,
                                           out_dtype=jnp.float32)
                t_out = mlp_single_forward(x_t, teacher_prepped,
                                           out_dtype=jnp.bfloat16)
            return s_out, jax.lax.stop_gradient(t_out), new_teacher

        # One XLA program per forward (EMA + both networks); teacher leaves are
        # donated so the aliased EMA outputs genuinely reuse their HBM buffers.
        self._step = jax.jit(step, static_argnums=(6, 7), donate_argnums=(4,))

    def build_input_dict(self, inputs, remapping):
        if not remapping:
            return inputs
        output_dict = {}
        for output_path, input_path in remapping.items():
            source = inputs
            for p in input_path.split("."):
                source = source[p]
            parts = output_path.split(".")
            cur = output_dict
            for p in parts[:-1]:
                cur = cur.setdefault(p, {})
            cur[parts[-1]] = source
        return output_dict

    def forward(self, inputs):
        if "prefix" in inputs:
            prefix = inputs["prefix"]
        else:
            prefix = []
            inputs["prefix"] = prefix

        outputs = inputs
        for p in prefix:
            outputs = outputs[p]

        prefix.append("student")
        outputs["student"] = {}
        student_inputs = self.build_input_dict(inputs, self.student_remapping)
        teacher_inputs = self.build_input_dict(inputs, self.teacher_remapping)
        x_student = {**inputs, **student_inputs}["x"]
        x_teacher = {**inputs, **teacher_inputs}["x"]
        same_x = x_student is x_teacher

        s_out, t_out, new_teacher = self._step(
            x_student, x_teacher, self.student_params, self._student_prepped,
            self.teacher_params, jnp.asarray(inputs["global_step"]),
            self.training, same_x)
        # Old teacher buffers were donated; always adopt the returned leaves.
        self.teacher_params = new_teacher

        outputs["student"] = s_out
        student_output = outputs["student"]
        outputs["student"] = {}
        outputs["teacher"] = t_out
        prefix.pop()
        outputs["student"] = student_output
        return outputs


# ----------------------------------------------------------------------------
# Main
# ----------------------------------------------------------------------------
if __name__ == "__main__":
    # Lane-dense feature dims (multiples of 128) so MXU/store tiles are full.
    B, S, D, H = 2, 8, 128, 256

    key = jax.random.PRNGKey(0)
    kx, kw1, kb1, kw2, kb2 = jax.random.split(key, 5)

    x = jax.random.normal(kx, (B, S, D), dtype=jnp.float32)
    student_params = {
        "w1": jax.random.normal(kw1, (D, H), jnp.float32) / math.sqrt(D),
        "b1": jax.random.normal(kb1, (H,), jnp.float32) * 0.01,
        "w2": jax.random.normal(kw2, (H, D), jnp.float32) / math.sqrt(H),
        "b2": jax.random.normal(kb2, (D,), jnp.float32) * 0.01,
    }

    model = EMASelfDistillation(student_params, cosine_ema_schedule)

    inputs = {"x": x, "global_step": jnp.asarray(100, jnp.int32)}
    outputs = model.forward(inputs)

    jax.block_until_ready(outputs["student"])
    jax.block_until_ready(outputs["teacher"])
    jax.block_until_ready(model.teacher_params)

    # ---- correctness checks ----
    def mlp_ref(xa, p):
        x2 = xa.reshape(-1, xa.shape[-1]).astype(jnp.bfloat16)
        h = jnp.dot(x2, p["w1"].astype(jnp.bfloat16),
                    preferred_element_type=jnp.float32) + p["b1"]
        h = jnp.maximum(h, 0.0).astype(jnp.bfloat16)
        y = jnp.dot(h, p["w2"].astype(jnp.bfloat16),
                    preferred_element_type=jnp.float32) + p["b2"]
        return y.reshape(xa.shape)

    # teacher started equal to student, so post-EMA teacher params == student.
    for name in student_params:
        assert jnp.allclose(model.teacher_params[name], student_params[name],
                            rtol=1e-5, atol=1e-6), name

    assert outputs["student"].shape == (B, S, D)
    assert outputs["teacher"].shape == (B, S, D)
    assert outputs["student"].dtype == jnp.float32
    assert outputs["teacher"].dtype == jnp.bfloat16
    assert jnp.allclose(outputs["student"], mlp_ref(x, student_params),
                        rtol=1e-2, atol=1e-2)
    assert jnp.allclose(outputs["teacher"].astype(jnp.float32),
                        mlp_ref(x, model.teacher_params),
                        rtol=2e-2, atol=2e-2)

    print("KERNEL_OK")
</pallas_src>

<mosaic_0001>
module attributes {stable_mosaic.version = 11 : i64} {
  func.func @_mlp_pair_kernel(%arg0: i32, %arg1: memref<8x128xf32, #tpu.memory_space<vmem>>, %arg2: memref<128x512xbf16, #tpu.memory_space<vmem>>, %arg3: memref<1x512xf32, #tpu.memory_space<vmem>>, %arg4: memref<256x128xbf16, #tpu.memory_space<vmem>>, %arg5: memref<1x128xf32, #tpu.memory_space<vmem>>, %arg6: memref<256x128xbf16, #tpu.memory_space<vmem>>, %arg7: memref<1x128xf32, #tpu.memory_space<vmem>>, %arg8: memref<8x128xf32, #tpu.memory_space<vmem>>, %arg9: memref<8x128xbf16, #tpu.memory_space<vmem>>) attributes {dimension_semantics = [#tpu.dimension_semantics<parallel>], iteration_bounds = array<i64: 2>, scalar_prefetch = 0 : i64, scratch_operands = 0 : i64, tpu.core_type = #tpu.core_type<tc>, window_params = [{transform_indices = @transform_0, window_bounds = array<i64: 8, 128>}, {pipeline_mode = #tpu.pipeline_mode<synchronous>, transform_indices = @transform_1, window_bounds = array<i64: 128, 512>}, {pipeline_mode = #tpu.pipeline_mode<synchronous>, transform_indices = @transform_2, window_bounds = array<i64: 1, 512>}, {pipeline_mode = #tpu.pipeline_mode<synchronous>, transform_indices = @transform_3, window_bounds = array<i64: 256, 128>}, {pipeline_mode = #tpu.pipeline_mode<synchronous>, transform_indices = @transform_4, window_bounds = array<i64: 1, 128>}, {pipeline_mode = #tpu.pipeline_mode<synchronous>, transform_indices = @transform_5, window_bounds = array<i64: 256, 128>}, {pipeline_mode = #tpu.pipeline_mode<synchronous>, transform_indices = @transform_6, window_bounds = array<i64: 1, 128>}, {transform_indices = @transform_7, window_bounds = array<i64: 8, 128>}, {transform_indices = @transform_8, window_bounds = array<i64: 8, 128>}]} {
    %c0 = arith.constant 0 : index
    %c0_0 = arith.constant 0 : index
    %0 = vector.load %arg1[%c0, %c0_0] : memref<8x128xf32, #tpu.memory_space<vmem>>, vector<8x128xf32>
    %1 = arith.truncf %0 : vector<8x128xf32> to vector<8x128xbf16>
    %c0_1 = arith.constant 0 : index
    %c0_2 = arith.constant 0 : index
    %2 = vector.load %arg2[%c0_1, %c0_2] : memref<128x512xbf16, #tpu.memory_space<vmem>>, vector<128x512xbf16>
    %cst = arith.constant dense<0.000000e+00> : vector<8x512xf32>
    %3 = tpu.matmul %1, %2, %cst {dimension_numbers = #tpu.dot_dimension_numbers<[1], [0], [0], [1], [0, 0, 1, 1], [], []>} : vector<8x128xbf16>, vector<128x512xbf16>, vector<8x512xf32> -> vector<8x512xf32>
    %c0_3 = arith.constant 0 : index
    %c0_4 = arith.constant 0 : index
    %4 = vector.load %arg3[%c0_3, %c0_4] : memref<1x512xf32, #tpu.memory_space<vmem>>, vector<1x512xf32>
    %5 = vector.broadcast %4 : vector<1x512xf32> to vector<8x512xf32>
    %6 = arith.addf %3, %5 : vector<8x512xf32>
    %cst_5 = arith.constant 0.000000e+00 : f32
    %7 = vector.broadcast %cst_5 : f32 to vector<8x512xf32>
    %8 = arith.maximumf %6, %7 : vector<8x512xf32>
    %9 = arith.truncf %8 : vector<8x512xf32> to vector<8x512xbf16>
    %10 = vector.extract_strided_slice %9 {offsets = [0, 0], sizes = [8, 256], strides = [1, 1]} : vector<8x512xbf16> to vector<8x256xbf16>
    %c0_6 = arith.constant 0 : index
    %c0_7 = arith.constant 0 : index
    %11 = vector.load %arg4[%c0_6, %c0_7] : memref<256x128xbf16, #tpu.memory_space<vmem>>, vector<256x128xbf16>
    %cst_8 = arith.constant dense<0.000000e+00> : vector<8x128xf32>
    %12 = tpu.matmul %10, %11, %cst_8 {dimension_numbers = #tpu.dot_dimension_numbers<[1], [0], [0], [1], [0, 0, 1, 1], [], []>} : vector<8x256xbf16>, vector<256x128xbf16>, vector<8x128xf32> -> vector<8x128xf32>
    %c0_9 = arith.constant 0 : index
    %c0_10 = arith.constant 0 : index
    %13 = vector.load %arg5[%c0_9, %c0_10] : memref<1x128xf32, #tpu.memory_space<vmem>>, vector<1x128xf32>
    %14 = vector.broadcast %13 : vector<1x128xf32> to vector<8x128xf32>
    %15 = arith.addf %12, %14 : vector<8x128xf32>
    %16 = vector.extract_strided_slice %9 {offsets = [0, 256], sizes = [8, 256], strides = [1, 1]} : vector<8x512xbf16> to vector<8x256xbf16>
    %c0_11 = arith.constant 0 : index
    %c0_12 = arith.constant 0 : index
    %17 = vector.load %arg6[%c0_11, %c0_12] : memref<256x128xbf16, #tpu.memory_space<vmem>>, vector<256x128xbf16>
    %cst_13 = arith.constant dense<0.000000e+00> : vector<8x128xf32>
    %18 = tpu.matmul %16, %17, %cst_13 {dimension_numbers = #tpu.dot_dimension_numbers<[1], [0], [0], [1], [0, 0, 1, 1], [], []>} : vector<8x256xbf16>, vector<256x128xbf16>, vector<8x128xf32> -> vector<8x128xf32>
    %c0_14 = arith.constant 0 : index
    %c0_15 = arith.constant 0 : index
    %19 = vector.load %arg7[%c0_14, %c0_15] : memref<1x128xf32, #tpu.memory_space<vmem>>, vector<1x128xf32>
    %20 = vector.broadcast %19 : vector<1x128xf32> to vector<8x128xf32>
    %21 = arith.addf %18, %20 : vector<8x128xf32>
    %c0_16 = arith.constant 0 : index
    %c0_17 = arith.constant 0 : index
    %22 = vector.load %arg8[%c0_16, %c0_17] : memref<8x128xf32, #tpu.memory_space<vmem>>, vector<8x128xf32>
    tpu.vector_store %arg8[%c0_16, %c0_17], %15 {strides = array<i32>} : memref<8x128xf32, #tpu.memory_space<vmem>>, vector<8x128xf32>,
    %23 = arith.truncf %21 : vector<8x128xf32> to vector<8x128xbf16>
    %c0_18 = arith.constant 0 : index
    %c0_19 = arith.constant 0 : index
    %24 = vector.load %arg9[%c0_18, %c0_19] : memref<8x128xbf16, #tpu.memory_space<vmem>>, vector<8x128xbf16>
    tpu.vector_store %arg9[%c0_18, %c0_19], %23 {strides = array<i32>} : memref<8x128xbf16, #tpu.memory_space<vmem>>, vector<8x128xbf16>,
    return
  }
  func.func @transform_0(%arg0: i32) -> (i32, i32) {
    %c0_i32 = arith.constant 0 : i32
    %c0_i32_0 = arith.constant 0 : i32
    return %arg0, %c0_i32 : i32, i32
  }
  func.func @transform_1(%arg0: i32) -> (i32, i32) {
    %c0_i32 = arith.constant 0 : i32
    %c0_i32_0 = arith.constant 0 : i32
    %c0_i32_1 = arith.constant 0 : i32
    return %c0_i32, %c0_i32_0 : i32, i32
  }
  func.func @transform_2(%arg0: i32) -> (i32, i32) {
    %c0_i32 = arith.constant 0 : i32
    %c0_i32_0 = arith.constant 0 : i32
    %c0_i32_1 = arith.constant 0 : i32
    return %c0_i32, %c0_i32_0 : i32, i32
  }
  func.func @transform_3(%arg0: i32) -> (i32, i32) {
    %c0_i32 = arith.constant 0 : i32
    %c0_i32_0 = arith.constant 0 : i32
    %c0_i32_1 = arith.constant 0 : i32
    return %c0_i32, %c0_i32_0 : i32, i32
  }
  func.func @transform_4(%arg0: i32) -> (i32, i32) {
    %c0_i32 = arith.constant 0 : i32
    %c0_i32_0 = arith.constant 0 : i32
    %c0_i32_1 = arith.constant 0 : i32
    return %c0_i32, %c0_i32_0 : i32, i32
  }
  func.func @transform_5(%arg0: i32) -> (i32, i32) {
    %c0_i32 = arith.constant 0 : i32
    %c0_i32_0 = arith.constant 0 : i32
    %c0_i32_1 = arith.constant 0 : i32
    return %c0_i32, %c0_i32_0 : i32, i32
  }
  func.func @transform_6(%arg0: i32) -> (i32, i32) {
    %c0_i32 = arith.constant 0 : i32
    %c0_i32_0 = arith.constant 0 : i32
    %c0_i32_1 = arith.constant 0 : i32
    return %c0_i32, %c0_i32_0 : i32, i32
  }
  func.func @transform_7(%arg0: i32) -> (i32, i32) {
    %c0_i32 = arith.constant 0 : i32
    %c0_i32_0 = arith.constant 0 : i32
    return %arg0, %c0_i32 : i32, i32
  }
  func.func @transform_8(%arg0: i32) -> (i32, i32) {
    %c0_i32 = arith.constant 0 : i32
    %c0_i32_0 = arith.constant 0 : i32
    return %arg0, %c0_i32 : i32, i32
  }
}

module attributes {stable_mosaic.version = 11 : i64} {
  func.func @_ema_kernel(%arg0: memref<1xf32, #tpu.memory_space<smem>>, %arg1: memref<1x256xf32, #tpu.memory_space<vmem>>, %arg2: memref<1x128xf32, #tpu.memory_space<vmem>>, %arg3: memref<128x256xf32, #tpu.memory_space<vmem>>, %arg4: memref<256x128xf32, #tpu.memory_space<vmem>>, %arg5: memref<1x256xf32, #tpu.memory_space<vmem>>, %arg6: memref<1x128xf32, #tpu.memory_space<vmem>>, %arg7: memref<128x256xf32, #tpu.memory_space<vmem>>, %arg8: memref<256x128xf32, #tpu.memory_space<vmem>>, %arg9: memref<1x256xf32, #tpu.memory_space<vmem>>, %arg10: memref<1x128xf32, #tpu.memory_space<vmem>>, %arg11: memref<128x256xf32, #tpu.memory_space<vmem>>, %arg12: memref<256x128xf32, #tpu.memory_space<vmem>>, %arg13: memref<1x256xbf16, #tpu.memory_space<vmem>>, %arg14: memref<1x128xbf16, #tpu.memory_space<vmem>>, %arg15: memref<128x256xbf16, #tpu.memory_space<vmem>>, %arg16: memref<256x128xbf16, #tpu.memory_space<vmem>>) attributes {dimension_semantics = [], scalar_prefetch = 0 : i64, scratch_operands = 0 : i64, tpu.core_type = #tpu.core_type<tc>} {
    %c0 = arith.constant 0 : index
    %0 = memref.load %arg0[%c0] : memref<1xf32, #tpu.memory_space<smem>>
    %cst = arith.constant 1.000000e+00 : f32
    %1 = arith.subf %cst, %0 : f32
    %c0_0 = arith.constant 0 : index
    %c0_1 = arith.constant 0 : index
    %2 = vector.load %arg1[%c0_0, %c0_1] : memref<1x256xf32, #tpu.memory_space<vmem>>, vector<1x256xf32>
    %c0_2 = arith.constant 0 : index
    %c0_3 = arith.constant 0 : index
    %3 = vector.load %arg5[%c0_2, %c0_3] : memref<1x256xf32, #tpu.memory_space<vmem>>, vector<1x256xf32>
    %4 = arith.subf %2, %3 : vector<1x256xf32>
    %5 = vector.broadcast %1 : f32 to vector<1x256xf32>
    %6 = arith.mulf %5, %4 : vector<1x256xf32>
    %7 = arith.addf %3, %6 : vector<1x256xf32>
    %c0_4 = arith.constant 0 : index
    %c0_5 = arith.constant 0 : index
    %8 = vector.load %arg9[%c0_4, %c0_5] : memref<1x256xf32, #tpu.memory_space<vmem>>, vector<1x256xf32>
    tpu.vector_store %arg9[%c0_4, %c0_5], %7 {strides = array<i32>} : memref<1x256xf32, #tpu.memory_space<vmem>>, vector<1x256xf32>,
    %9 = arith.truncf %7 : vector<1x256xf32> to vector<1x256xbf16>
    %c0_6 = arith.constant 0 : index
    %c0_7 = arith.constant 0 : index
    %10 = vector.load %arg13[%c0_6, %c0_7] : memref<1x256xbf16, #tpu.memory_space<vmem>>, vector<1x256xbf16>
    tpu.vector_store %arg13[%c0_6, %c0_7], %9 {strides = array<i32>} : memref<1x256xbf16, #tpu.memory_space<vmem>>, vector<1x256xbf16>,
    %c0_8 = arith.constant 0 : index
    %c0_9 = arith.constant 0 : index
    %11 = vector.load %arg2[%c0_8, %c0_9] : memref<1x128xf32, #tpu.memory_space<vmem>>, vector<1x128xf32>
    %c0_10 = arith.constant 0 : index
    %c0_11 = arith.constant 0 : index
    %12 = vector.load %arg6[%c0_10, %c0_11] : memref<1x128xf32, #tpu.memory_space<vmem>>, vector<1x128xf32>
    %13 = arith.subf %11, %12 : vector<1x128xf32>
    %14 = vector.broadcast %1 : f32 to vector<1x128xf32>
    %15 = arith.mulf %14, %13 : vector<1x128xf32>
    %16 = arith.addf %12, %15 : vector<1x128xf32>
    %c0_12 = arith.constant 0 : index
    %c0_13 = arith.constant 0 : index
    %17 = vector.load %arg10[%c0_12, %c0_13] : memref<1x128xf32, #tpu.memory_space<vmem>>, vector<1x128xf32>
    tpu.vector_store %arg10[%c0_12, %c0_13], %16 {strides = array<i32>} : memref<1x128xf32, #tpu.memory_space<vmem>>, vector<1x128xf32>,
    %18 = arith.truncf %16 : vector<1x128xf32> to vector<1x128xbf16>
    %c0_14 = arith.constant 0 : index
    %c0_15 = arith.constant 0 : index
    %19 = vector.load %arg14[%c0_14, %c0_15] : memref<1x128xbf16, #tpu.memory_space<vmem>>, vector<1x128xbf16>
    tpu.vector_store %arg14[%c0_14, %c0_15], %18 {strides = array<i32>} : memref<1x128xbf16, #tpu.memory_space<vmem>>, vector<1x128xbf16>,
    %c0_16 = arith.constant 0 : index
    %c0_17 = arith.constant 0 : index
    %20 = vector.load %arg3[%c0_16, %c0_17] : memref<128x256xf32, #tpu.memory_space<vmem>>, vector<128x256xf32>
    %c0_18 = arith.constant 0 : index
    %c0_19 = arith.constant 0 : index
    %21 = vector.load %arg7[%c0_18, %c0_19] : memref<128x256xf32, #tpu.memory_space<vmem>>, vector<128x256xf32>
    %22 = arith.subf %20, %21 : vector<128x256xf32>
    %23 = vector.broadcast %1 : f32 to vector<128x256xf32>
    %24 = arith.mulf %23, %22 : vector<128x256xf32>
    %25 = arith.addf %21, %24 : vector<128x256xf32>
    %c0_20 = arith.constant 0 : index
    %c0_21 = arith.constant 0 : index
    %26 = vector.load %arg11[%c0_20, %c0_21] : memref<128x256xf32, #tpu.memory_space<vmem>>, vector<128x256xf32>
    tpu.vector_store %arg11[%c0_20, %c0_21], %25 {strides = array<i32>} : memref<128x256xf32, #tpu.memory_space<vmem>>, vector<128x256xf32>,
    %27 = arith.truncf %25 : vector<128x256xf32> to vector<128x256xbf16>
    %c0_22 = arith.constant 0 : index
    %c0_23 = arith.constant 0 : index
    %28 = vector.load %arg15[%c0_22, %c0_23] : memref<128x256xbf16, #tpu.memory_space<vmem>>, vector<128x256xbf16>
    tpu.vector_store %arg15[%c0_22, %c0_23], %27 {strides = array<i32>} : memref<128x256xbf16, #tpu.memory_space<vmem>>, vector<128x256xbf16>,
    %c0_24 = arith.constant 0 : index
    %c0_25 = arith.constant 0 : index
    %29 = vector.load %arg4[%c0_24, %c0_25] : memref<256x128xf32, #tpu.memory_space<vmem>>, vector<256x128xf32>
    %c0_26 = arith.constant 0 : index
    %c0_27 = arith.constant 0 : index
    %30 = vector.load %arg8[%c0_26, %c0_27] : memref<256x128xf32, #tpu.memory_space<vmem>>, vector<256x128xf32>
    %31 = arith.subf %29, %30 : vector<256x128xf32>
    %32 = vector.broadcast %1 : f32 to vector<256x128xf32>
    %33 = arith.mulf %32, %31 : vector<256x128xf32>
    %34 = arith.addf %30, %33 : vector<256x128xf32>
    %c0_28 = arith.constant 0 : index
    %c0_29 = arith.constant 0 : index
    %35 = vector.load %arg12[%c0_28, %c0_29] : memref<256x128xf32, #tpu.memory_space<vmem>>, vector<256x128xf32>
    tpu.vector_store %arg12[%c0_28, %c0_29], %34 {strides = array<i32>} : memref<256x128xf32, #tpu.memory_space<vmem>>, vector<256x128xf32>,
    %36 = arith.truncf %34 : vector<256x128xf32> to vector<256x128xbf16>
    %c0_30 = arith.constant 0 : index
    %c0_31 = arith.constant 0 : index
    %37 = vector.load %arg16[%c0_30, %c0_31] : memref<256x128xbf16, #tpu.memory_space<vmem>>, vector<256x128xbf16>
    tpu.vector_store %arg16[%c0_30, %c0_31], %36 {strides = array<i32>} : memref<256x128xbf16, #tpu.memory_space<vmem>>, vector<256x128xbf16>,
    return
  }
}

</mosaic_0001>

<bundles_post_ra>
// kernel: step.3
= control target key start
LH: loop header
LB: loop body
LE: loop exit
PB: predicated region body
PF: predicated region fallthrough
CT: control target
= control target key end

     0   :  { %s2325_s0 = inlined_call_operand.hbm [shape: f32[16,128], index: 0, kind: input, shape index: {}]   ;;  %s2326_s1 = inlined_call_operand.hbm [shape: bf16[128,512], index: 1, kind: input, shape index: {}]   ;;  %s2327_s2 = inlined_call_operand.hbm [shape: f32[1,512], index: 2, kind: input, shape index: {}]   ;;  %s2328_s3 = inlined_call_operand.hbm [shape: bf16[256,128], index: 3, kind: input, shape index: {}]   ;;  %s2329_s4 = inlined_call_operand.hbm [shape: f32[1,128], index: 4, kind: input, shape index: {}]   ;;  %s2330_s5 = inlined_call_operand.hbm [shape: bf16[256,128], index: 5, kind: input, shape index: {}]   ;;  %s2331_s6 = inlined_call_operand.hbm [shape: f32[1,128], index: 6, kind: input, shape index: {}]   ;;  %s2332_s7 = inlined_call_operand.hbm [shape: f32[16,128], index: 7, kind: output, shape index: {0}]   ;;  %s2333_s8 = inlined_call_operand.hbm [shape: bf16[16,128], index: 8, kind: output, shape index: {1}]  }
   0x1   :  { %2337 = sst [smem:[#allocation23_spill]] %s2326_s1 }
   0x2   :  { %14 = vsyncpa [#allocation3], 0 }
   0x3   :  { %16 = vsyncpa [#allocation3 + $0x1], 0 }
   0x4   :  { %17 = vsyncpa [#allocation6], 0 }
   0x5   :  { %18 = vsyncpa [#allocation9], 0 }
   0x6   :  { %19 = vsyncpa [#allocation12], 0 }
   0x7   :  { %20 = vsyncpa [#allocation4], 0 }
   0x8   :  { %22 = vsyncpa [#allocation4 + $0x1], 0 }
   0x9   :  { %23 = vsyncpa [#allocation16], 0 }
   0xa   :  { %25 = vsyncpa [#allocation16 + $0x1], 0  ;;  %s1967_s27 = smov 0   ;;  %s1969_s28 = smov 0  }
   0xb   :  { %s1971_s29 = smov 0   ;;  %s1973_s30 = smov 0  }
   0xc LB: > { %s1908_s9 = smov [#allocation5]   ;;  %s1988_s11 = sadd.s32 4294967295, %s1906_s30   ;;  %s1906_s30 = sphi %s1973_s30, %s2361_s30   ;;  %s1902_s29 = sphi %s1971_s29, %s2360_s29   ;;  %s1898_s28 = sphi %s1969_s28, %s2359_s28   ;;  %s1894_s27 = sphi %s1967_s27, %s2358_s27  }
   0xd   : > { %s252_s10 = sshll.u32 %s1908_s9, 4  ;;  %p1265_p0 = scmp.ge.s32.totalorder %s1906_s30, 1  ;;  %s1993_s10 = int_to_ptr.vmem [resolvable:$true] %s252_s10 }
   0xe   : > { %p2334_p1 = scmp.eq.s32.totalorder %s1988_s11, 0  ;;  %p240_p2 = scmp.lt.s32.totalorder %s1906_s30, 3 }
   0xf   : > { %s1909_s13 = smov [#allocation8]   ;;  %s1910_s16 = smov [#allocation11]  }
  0x10   : > { %p1995_p3 = pnand %p1265_p0, %p240_p2  ;;  %s276_s14 = sshll.u32 %s1909_s13, 4  ;;  %s2008_s14 = int_to_ptr.vmem [resolvable:$true] %s276_s14 }
  0x11   : > { %s2010_s17 = sshll.u32 %s1910_s16, 4  ;;  %s2340_s1 = sld [smem:[#allocation23_spill]]  ;;  %s301_s17 = int_to_ptr.vmem [resolvable:$true] %s2010_s17 }
  0x12   : > { %s2338_s12 = scalar_select %p1995_p3, 1, 0 }
  0x13   : > { %p1431_p5 = pneg %p1995_p3 }
  0x15   : > { %p2004_p6 = pnand %p1431_p5, %p2334_p1 }
  0x17   : > { %s1598_s20 = scalar_lea.hbm %s2340_s1, 4096  ;;  %p2020_p8 = pneg %p2004_p6 }
  0x18   : > { %p1599_p7 = scmp.ne.s32.totalorder %s2340_s1, %s1598_s20  ;;  %p1605_p11 = scmp.lt.u32.totalorder %s1598_s20, %s2340_s1 }
  0x1a   : > { %p1601_p9 = pnand %p2020_p8, %p1599_p7 }
  0x1c   : > { %p1602_p10 = pneg %p1601_p9 }
  0x1e   : > { %p1607_p12 = pnand %p1605_p11, %p1602_p10 }
  0x20   : > { %1610 = shalt.err (!%p1607_p12)
}
  0x21   : > { %s1611_s26 = scalar_lea.vmem %s1993_s10, 4096  ;;  %p1619_p5 = scmp.lt.s32.totalorder %s1993_s10, %s1993_s10 }
  0x22   : > { %p1612_p13 = scmp.ne.s32.totalorder %s1993_s10, %s1611_s26  ;;  %p1620_p4 = scmp.lt.s32.totalorder %s1611_s26, %s1611_s26 }
  0x24   : > { %p1614_p0 = pnand %p1612_p13, %p2020_p8  ;;  %p1621_p7 = por %p1620_p4, %p1619_p5 }
  0x26   : > { %p1615_p2 = pneg %p1614_p0 }
  0x28   : > { %p1622_p9 = pnand %p1621_p7, %p1615_p2 }
  0x2a   : > { %1625 = shalt.err (!%p1622_p9)
}
  0x2b   : > { %s1911_s9 = smov 256   ;;  %s1912_s13 = smov 16  }
  0x2c   : > { %1434 = dma.hbm_to_vmem [thread:$0]  (!%p2004_p6), %s2340_s1, 4096, %s1993_s10, [#allocation6], %s1911_s9, %s1911_s9, %s1912_s13  }
  0x2d   : > { %s1626_s21 = scalar_lea.hbm %s2328_s3, 2048 }
  0x2e   : > { %p1627_p4 = scmp.ne.s32.totalorder %s2328_s3, %s1626_s21  ;;  %p1633_p12 = scmp.lt.u32.totalorder %s1626_s21, %s2328_s3 }
  0x30   : > { %p1629_p10 = pnand %p1627_p4, %p2020_p8 }
  0x32   : > { %p1630_p11 = pneg %p1629_p10 }
  0x34   : > { %p1635_p13 = pnand %p1633_p12, %p1630_p11 }
  0x36   : > { %1638 = shalt.err (!%p1635_p13)
}
  0x37   : > { %s1639_s10 = scalar_lea.vmem %s2008_s14, 2048  ;;  %p1647_p7 = scmp.lt.s32.totalorder %s2008_s14, %s2008_s14 }
  0x38   : > { %p1640_p0 = scmp.ne.s32.totalorder %s2008_s14, %s1639_s10  ;;  %p1648_p9 = scmp.lt.s32.totalorder %s1639_s10, %s1639_s10 }
  0x3a   : > { %p1642_p2 = pnand %p1640_p0, %p2020_p8  ;;  %p1649_p4 = por %p1648_p9, %p1647_p7 }
  0x3c   : > { %p1643_p5 = pneg %p1642_p2 }
  0x3e   : > { %p1650_p10 = pnand %p1649_p4, %p1643_p5 }
  0x40   : > { %1653 = shalt.err (!%p1650_p10)
}
  0x41   : > { %s1913_s9 = smov 64   ;;  %s1914_s13 = smov 4  }
  0x42   : > { %1440 = dma.hbm_to_vmem [thread:$0]  (!%p2004_p6), %s2328_s3, 2048, %s2008_s14, [#allocation9], %s1913_s9, %s1913_s9, %s1914_s13  }
  0x43   : > { %s1654_s21 = scalar_lea.hbm %s2330_s5, 2048 }
  0x44   : > { %p1655_p11 = scmp.ne.s32.totalorder %s2330_s5, %s1654_s21  ;;  %p1661_p0 = scmp.lt.u32.totalorder %s1654_s21, %s2330_s5 }
  0x46   : > { %p1657_p12 = pnand %p1655_p11, %p2020_p8 }
  0x48   : > { %p1658_p13 = pneg %p1657_p12 }
  0x4a   : > { %p1663_p2 = pnand %p1661_p0, %p1658_p13 }
  0x4c   : > { %1666 = shalt.err (!%p1663_p2)
}
  0x4d   : > { %s1667_s10 = scalar_lea.vmem %s301_s17, 2048  ;;  %p1675_p4 = scmp.lt.s32.totalorder %s301_s17, %s301_s17 }
  0x4e   : > { %p1668_p5 = scmp.ne.s32.totalorder %s301_s17, %s1667_s10  ;;  %p1676_p10 = scmp.lt.s32.totalorder %s1667_s10, %s1667_s10 }
  0x50   : > { %p1670_p7 = pnand %p1668_p5, %p2020_p8  ;;  %p1677_p1 = por %p1676_p10, %p1675_p4 }
  0x52   : > { %p1671_p9 = pneg %p1670_p7 }
  0x54   : > { %p1678_p3 = pnand %p1677_p1, %p1671_p9 }
  0x56   : > { %1681 = shalt.err (!%p1678_p3)
}
  0x57   : > { %1446 = dma.hbm_to_vmem [thread:$0]  (!%p2004_p6), %s2330_s5, 2048, %s301_s17, [#allocation12], %s1913_s9, %s1913_s9, %s1914_s13  }
  0x58   : > { %s1915_s18 = smov [#allocation7]   ;;  %s1916_s20 = smov [#allocation10]  }
  0x59   : > { %s266_s19 = sshll.u32 %s1915_s18, 4  ;;  %s290_s21 = sshll.u32 %s1916_s20, 4  ;;  %s267_s19 = int_to_ptr.vmem [resolvable:$true] %s266_s19  ;;  %s291_s21 = int_to_ptr.vmem [resolvable:$true] %s290_s21 }
  0x5a   : > { %s1682_s25 = scalar_lea.hbm %s2327_s2, 64 }
  0x5b   : > { %p1683_p1 = scmp.ne.s32.totalorder %s2327_s2, %s1682_s25  ;;  %p1689_p12 = scmp.lt.u32.totalorder %s1682_s25, %s2327_s2 }
  0x5d   : > { %p1685_p3 = pnand %p1683_p1, %p2020_p8 }
  0x5f   : > { %p1686_p11 = pneg %p1685_p3 }
  0x61   : > { %p1691_p13 = pnand %p1689_p12, %p1686_p11 }
  0x63   : > { %1694 = shalt.err (!%p1691_p13)
}
  0x64   : > { %s1695_s17 = scalar_lea.vmem %s267_s19, 64  ;;  %p1703_p7 = scmp.lt.s32.totalorder %s267_s19, %s267_s19 }
  0x65   : > { %p1696_p0 = scmp.ne.s32.totalorder %s267_s19, %s1695_s17  ;;  %p1704_p9 = scmp.lt.s32.totalorder %s1695_s17, %s1695_s17 }
  0x67   : > { %p1698_p2 = pnand %p1696_p0, %p2020_p8  ;;  %p1705_p4 = por %p1704_p9, %p1703_p7 }
  0x69   : > { %p1699_p5 = pneg %p1698_p2 }
  0x6b   : > { %p1706_p10 = pnand %p1705_p4, %p1699_p5 }
  0x6d   : > { %1709 = shalt.err (!%p1706_p10)
}
  0x6e   : > { %1437 = dma.hbm_to_vmem [thread:$0]  (!%p2004_p6), %s2327_s2, 64, %s267_s19, [#allocation6]  }
  0x6f   : > { %s1710_s18 = scalar_lea.hbm %s2329_s4, 16 }
  0x70   : > { %p1711_p1 = scmp.ne.s32.totalorder %s2329_s4, %s1710_s18  ;;  %p1717_p12 = scmp.lt.u32.totalorder %s1710_s18, %s2329_s4 }
  0x72   : > { %p1713_p3 = pnand %p1711_p1, %p2020_p8 }
  0x74   : > { %p1714_p11 = pneg %p1713_p3 }
  0x76   : > { %p1719_p13 = pnand %p1717_p12, %p1714_p11 }
  0x78   : > { %1722 = shalt.err (!%p1719_p13)
}
  0x79   : > { %s1723_s26 = scalar_lea.vmem %s291_s21, 16  ;;  %s1730_s19 = scalar_lea.vmem %s291_s21, 32 }
  0x7a   : > { %p1724_p0 = scmp.ne.s32.totalorder %s291_s21, %s1723_s26  ;;  %p1731_p7 = scmp.lt.s32.totalorder %s291_s21, %s291_s21 }
  0x7b   : > { %p1732_p9 = scmp.lt.s32.totalorder %s1730_s19, %s1723_s26 }
  0x7c   : > { %p1726_p2 = pnand %p1724_p0, %p2020_p8 }
  0x7d   : > { %p1733_p4 = por %p1732_p9, %p1731_p7 }
  0x7e   : > { %p1727_p5 = pneg %p1726_p2 }
  0x80   : > { %p1734_p10 = pnand %p1733_p4, %p1727_p5 }
  0x82   : > { %1737 = shalt.err (!%p1734_p10)
}
  0x83   : > { %1443 = dma.hbm_to_vmem [thread:$0]  (!%p2004_p6), %s2329_s4, 16, %s291_s21, [#allocation9]  }
  0x84   : > { %s1917_s17 = smov [#allocation13]   ;;  %s1738_s16 = scalar_lea.hbm %s2331_s6, 16 }
  0x85   : > { %s314_s9 = sshll.u32 %s1917_s17, 4  ;;  %p1739_p1 = scmp.ne.s32.totalorder %s2331_s6, %s1738_s16  ;;  %s315_s9 = int_to_ptr.vmem [resolvable:$true] %s314_s9 }
  0x86   : > { %p1745_p12 = scmp.lt.u32.totalorder %s1738_s16, %s2331_s6 }
  0x87   : > { %p1741_p3 = pnand %p1739_p1, %p2020_p8 }
  0x89   : > { %p1742_p11 = pneg %p1741_p3 }
  0x8b   : > { %p1747_p13 = pnand %p1745_p12, %p1742_p11 }
  0x8d   : > { %1750 = shalt.err (!%p1747_p13)
}
  0x8e   : > { %s1751_s21 = scalar_lea.vmem %s315_s9, 16  ;;  %s1758_s25 = scalar_lea.vmem %s315_s9, 32 }
  0x8f   : > { %p1752_p0 = scmp.ne.s32.totalorder %s315_s9, %s1751_s21  ;;  %p1759_p7 = scmp.lt.s32.totalorder %s315_s9, %s315_s9 }
  0x90   : > { %p1760_p9 = scmp.lt.s32.totalorder %s1758_s25, %s1751_s21 }
  0x91   : > { %p1754_p2 = pnand %p1752_p0, %p2020_p8 }
  0x92   : > { %p1761_p4 = por %p1760_p9, %p1759_p7 }
  0x93   : > { %p1755_p5 = pneg %p1754_p2 }
  0x95   : > { %p1762_p10 = pnand %p1761_p4, %p1755_p5 }
  0x97   : > { %1765 = shalt.err (!%p1762_p10)
}
  0x98   : > { %1449 = dma.hbm_to_vmem [thread:$0]  (!%p2004_p6), %s2331_s6, 16, %s315_s9, [#allocation12]  }
  0x99   : > { %s1264_s23 = sadd.s32 4294967294, %s1906_s30   ;;  %s2139_s15 = sadd.s32 1, %s1906_s30  }
  0x9a   : > { %s35_s10 = ssub.s32 %s1906_s30, %s2139_s15  ;;  %s38_s14 = sadd.s32 1, %s1902_s29 }
  0x9b   : > { %p36_p8 = scmp.eq.s32.totalorder %s35_s10, 0  ;;  %p45_p1 = scmp.ne.s32.totalorder %s1902_s29, %s1898_s28 }
  0x9c   : > { %p46_p3 = scmp.eq.s32.totalorder %s1906_s30, 0  ;;  %p51_p11 = scmp.ne.s32.totalorder %s1898_s28, %s1894_s27 }
  0x9d   : > { %s2150_s17 = scalar_select %p36_p8, %s1902_s29, %s38_s14  }
  0x9e   : > { %p2152_p12 = por %p46_p3, %p45_p1  ;;  %p2343_p13 = scmp.eq.s32.totalorder %s1988_s11, 0 }
  0x9f   : > { %p201_p0 = scmp.eq.s32.totalorder %s1988_s11, 1  ;;  %p207_p2 = scmp.eq.s32.totalorder %s1264_s23, 1 }
  0xa0   : > { %p2158_p6 = por %p2343_p13, %p51_p11  ;;  %p1467_p5 = scmp.lt.s32.totalorder %s1906_s30, 2 }
  0xa1   : > { %s325_s1 = sand.u32 1, %s1902_s29   ;;  %p2165_p7 = por %p201_p0, %p45_p1 }
  0xa2   : > { %p2169_p9 = por %p207_p2, %p51_p11  ;;  %s1273_s20 = sshll.u32 %s325_s1, 3 }
  0xa3   : > { %s2345_s16 = scalar_select %p2165_p7, 1, 0 }
  0xa4   : > { %s2346_s18 = scalar_select %p2169_p9, 1, 0 }
  0xa5   : > { %s1274_s22 = sshll.u32 %s1906_s30, 7  ;;  %s329_s26 = scalar_lea.vmem [#allocation2], %s1273_s20 }
  0xa6   : > { %s2177_s25 = scalar_lea.hbm %s2325_s0, %s1274_s22  ;;  %s336_s19 = sshll.u32 %s329_s26, 4  ;;  %s2179_s19 = int_to_ptr.vmem [resolvable:$true] %s336_s19 }
  0xa7   : > { %p2183_p4 = pnand %p1467_p5, %p2152_p12  ;;  %s326_s10 = scalar_lea.sflag [#allocation3], %s325_s1 }
  0xa8   : > { %s1766_s14 = scalar_lea.hbm %s2177_s25, 128  ;;  %s1771_s24 = scalar_lea.hbm %s2325_s0, 256 }
  0xa9   : > { %p1767_p10 = scmp.ne.s32.totalorder %s2177_s25, %s1766_s14  ;;  %p1768_p8 = pneg %p2183_p4 }
  0xaa   : > { %p1772_p11 = scmp.lt.u32.totalorder %s2177_s25, %s2325_s0  ;;  %p1773_p12 = scmp.lt.u32.totalorder %s1771_s24, %s1766_s14 }
  0xab   : > { %p1769_p1 = pnand %p1768_p8, %p1767_p10  ;;  %p1775_p0 = scmp.lt.u32.totalorder %s1766_s14, %s2177_s25 }
  0xac   : > { %p1774_p13 = por %p1773_p12, %p1772_p11 }
  0xad   : > { %p1770_p3 = pneg %p1769_p1 }
  0xae   : > { %p1776_p2 = por %p1775_p0, %p1774_p13 }
  0xb0   : > { %p1777_p5 = pnand %p1776_p2, %p1770_p3 }
  0xb2   : > { %1780 = shalt.err (!%p1777_p5)
}
  0xb3   : > { %s1781_s1 = scalar_lea.vmem %s2179_s19, 128  ;;  %s1918_s26 = smov [#allocation2]  }
  0xb4   : > { %p1782_p10 = scmp.ne.s32.totalorder %s2179_s19, %s1781_s1  ;;  %s1786_s20 = sshll.u32 %s1918_s26, 4  ;;  %s1787_s20 = int_to_ptr.vmem [resolvable:$false] %s1786_s20 }
  0xb5   : > { %s1788_s22 = scalar_lea.vmem %s1787_s20, 256  ;;  %p1789_p7 = scmp.lt.s32.totalorder %s2179_s19, %s1787_s20 }
  0xb6   : > { %p1784_p1 = pnand %p1782_p10, %p1768_p8  ;;  %p1790_p11 = scmp.lt.s32.totalorder %s1788_s22, %s1781_s1 }
  0xb8   : > { %p1785_p9 = pneg %p1784_p1  ;;  %p1791_p12 = por %p1790_p11, %p1789_p7 }
  0xba   : > { %p1792_p13 = pnand %p1791_p12, %p1785_p9 }
  0xbc   : > { %1795 = shalt.err (!%p1792_p13)
}
  0xbd   : > { %1453 = dma.hbm_to_vmem [thread:$0]  (!%p2183_p4), %s2177_s25, 128, %s2179_s19, %s326_s10  }
  0xbe   : > { %p2348_p3 = scmp.ne.s32.totalorder %s2338_s12, 0 }
  0xbf   : > { %s2215_s14 = sand.u32 (!%p2348_p3), 1, %s1898_s28  }
  0xc0   : > { %345 = sbr.rel (%p2348_p3) target bundleno = 717 (0x2cd), region = 48  ;;  %s1276_s24 = sshll.u32 (!%p2348_p3), %s2215_s14, 3 }
  0xc1   : > { %s348_s13 = scalar_lea.sflag (!%p2348_p3), [#allocation3], %s2215_s14  ;;  %s2221_s21 = scalar_lea.vmem (!%p2348_p3), [#allocation2], %s1276_s24 }
  0xc7   : > { %1869 = dma.done.wait (%p2158_p6), %s348_s13, 128  }
  0xc8   : > { %1871 = vsyncadd (%p2158_p6), %s348_s13, 4294967168  ;;  %p2349_p7 = scmp.eq.s32.totalorder %s1988_s11, 0 }
  0xca   : > { %1873 = dma.done.wait (%p2349_p7), [#allocation6], 4160   ;;  %p2350_p9 = pmov %p2349_p7 }
  0xcb   : > { %p2351_p4 = pmov %p2349_p7 }
  0xcc   : > { %1875 = vsyncadd (%p2350_p9), [#allocation6], 4294963136 }
  0xcd   : > { %1877 = dma.done.wait (%p2351_p4), [#allocation9], 2064   ;;  %p2352_p8 = pmov %p2351_p4 }
  0xce   : > { %p2353_p0 = pmov %p2351_p4 }
  0xcf   : > { %1879 = vsyncadd (%p2352_p8), [#allocation9], 4294965232 }
  0xd0   : > { %1881 = dma.done.wait (%p2353_p0), [#allocation12], 2064   ;;  %p2354_p2 = pmov %p2353_p0 }
  0xd1   : > { %v1919_v0 = vmov 0   ;;  %v1518_v1 = vld [vmem:[#allocation5 + $0x4] ss:$16 sps:$4 sm:$0xff]   ;;  %v1520_v2 = vld [vmem:[#allocation5 + $0xc] ss:$16 sps:$4 sm:$0xff]   ;;  %s1284_s12 = sshll.u32 %s2215_s14, 2 }
  0xd2   : > { %1883 = vsyncadd (%p2354_p2), [#allocation12], 4294965232  ;;  %662 = vmatprep.mubr.bf16.mxu0 %v1919_v0  ;;  %703 = vmatprep.mubr.bf16.mxu1 %v1919_v0  ;;  %v1522_v3 = vld [vmem:[#allocation5] ss:$16 sps:$4 sm:$0xff]   ;;  %v1523_v4 = vld [vmem:[#allocation5 + $0x8] ss:$16 sps:$4 sm:$0xff]  }
  0xd3   : > { %630 = vmatprep.subr.bf16.mxu0 %v1518_v1  ;;  %671 = vmatprep.subr.bf16.mxu1 %v1520_v2  ;;  %v1524_v5 = vld [vmem:[#allocation5 + $0x24] ss:$16 sps:$4 sm:$0xff]   ;;  %v1526_v6 = vld [vmem:[#allocation5 + $0x2c] ss:$16 sps:$4 sm:$0xff]   ;;  %v1528_v7 = vld [vmem:[#allocation5 + $0x20] ss:$16 sps:$4 sm:$0xff]  }
  0xd4   : > { %631 = vmatpush1.bf16.msra.mxu0 %v1522_v3  ;;  %672 = vmatpush1.bf16.msra.mxu1 %v1523_v4  ;;  %v1529_v8 = vld [vmem:[#allocation5 + $0x28] ss:$16 sps:$4 sm:$0xff]   ;;  %v1530_v9 = vld [vmem:[#allocation5 + $0x44] ss:$16 sps:$4 sm:$0xff]   ;;  %v1532_v10 = vld [vmem:[#allocation5 + $0x4c] ss:$16 sps:$4 sm:$0xff]   ;;  %v450_v3 = vlaneseq }
  0xd5   : > { %632 = vmatprep.subr.bf16.mxu0 %v1524_v5  ;;  %673 = vmatprep.subr.bf16.mxu1 %v1526_v6  ;;  %v1534_v11 = vld [vmem:[#allocation5 + $0x40] ss:$16 sps:$4 sm:$0xff]   ;;  %v1535_v12 = vld [vmem:[#allocation5 + $0x48] ss:$16 sps:$4 sm:$0xff]   ;;  %v1536_v13 = vld [vmem:[#allocation5 + $0x64] ss:$16 sps:$4 sm:$0xff]  }
  0xd6   : > { %v1538_v14 = vld [vmem:[#allocation5 + $0x6c] ss:$16 sps:$4 sm:$0xff]   ;;  %v1540_v15 = vld [vmem:[#allocation5 + $0x60] ss:$16 sps:$4 sm:$0xff]   ;;  %v1541_v16 = vld [vmem:[#allocation5 + $0x68] ss:$16 sps:$4 sm:$0xff]  }
  0xd7   : > { %v1542_v17 = vld [vmem:[#allocation5 + $0x84] ss:$16 sps:$4 sm:$0xff]   ;;  %v1544_v18 = vld [vmem:[#allocation5 + $0x8c] ss:$16 sps:$4 sm:$0xff]   ;;  %v1546_v19 = vld [vmem:[#allocation5 + $0x80] ss:$16 sps:$4 sm:$0xff]  }
  0xd8   : > { %633 = vmatpush1.bf16.msra.mxu0 %v1528_v7  ;;  %674 = vmatpush1.bf16.msra.mxu1 %v1529_v8  ;;  %v1547_v20 = vld [vmem:[#allocation5 + $0x88] ss:$16 sps:$4 sm:$0xff]   ;;  %v1548_v21 = vld [vmem:[#allocation5 + $0xa4] ss:$16 sps:$4 sm:$0xff]   ;;  %v1550_v22 = vld [vmem:[#allocation5 + $0xac] ss:$16 sps:$4 sm:$0xff]  }
  0xd9   : > { %634 = vmatprep.subr.bf16.mxu0 %v1530_v9  ;;  %675 = vmatprep.subr.bf16.mxu1 %v1532_v10  ;;  %v1552_v23 = vld [vmem:[#allocation5 + $0xa0] ss:$16 sps:$4 sm:$0xff]   ;;  %v1553_v24 = vld [vmem:[#allocation5 + $0xa8] ss:$16 sps:$4 sm:$0xff]   ;;  %v1554_v25 = vld [vmem:[#allocation5 + $0xc4] ss:$16 sps:$4 sm:$0xff]  }
  0xda   : > { %v1556_v26 = vld [vmem:[#allocation5 + $0xcc] ss:$16 sps:$4 sm:$0xff]   ;;  %v1558_v27 = vld [vmem:[#allocation5 + $0xc0] ss:$16 sps:$4 sm:$0xff]   ;;  %v1559_v28 = vld [vmem:[#allocation5 + $0xc8] ss:$16 sps:$4 sm:$0xff]  }
  0xdb   : > { %v1560_v29 = vld [vmem:[#allocation5 + $0xe4] ss:$16 sps:$4 sm:$0xff]   ;;  %v1562_v30 = vld [vmem:[#allocation5 + $0xec] ss:$16 sps:$4 sm:$0xff]   ;;  %v1564_v31 = vld [vmem:[#allocation5 + $0xe0] ss:$16 sps:$4 sm:$0xff]  }
  0xdc   : > { %635 = vmatpush1.bf16.msra.mxu0 %v1534_v11  ;;  %676 = vmatpush1.bf16.msra.mxu1 %v1535_v12  ;;  %v1565_v32 = vld [vmem:[#allocation5 + $0xe8] ss:$16 sps:$4 sm:$0xff]   ;;  %v1570_v39 = vld [vmem:[#allocation8 + $0x48] sm:$0xff]   ;;  %v1578_v47 = vld [vmem:[#allocation8 + $0x58] sm:$0xff]   ;;  %v451_v4 = vshrl.u32 %v450_v3, 7  ;;  %s1353_s9 = sshll.u32 %s1988_s11, 7 }
  0xdd   : > { %636 = vmatprep.subr.bf16.mxu0 %v1536_v13  ;;  %677 = vmatprep.subr.bf16.mxu1 %v1538_v14  ;;  %v414_v33 = vld [vmem:[%s2221_s21] sm:$0xff]  ;;  %v1566_v34 = vld [vmem:[#allocation8 + $0x40] sm:$0xff]   ;;  %v448_v7 = vld [vmem:[#allocation7] sm:$0xf]  ;;  %s405_s25 = scalar_lea.vmem [#allocation14], %s1276_s24  ;;  %s1354_s23 = sshll.u32 %s1988_s11, 6 }
  0xde   : > { %v1567_v35 = vld [vmem:[#allocation11 + $0x40] sm:$0xff]   ;;  %v415_v37 = vpack.c.bf16 %v414_v33, %v414_v33  ;;  %v1571_v40 = vld [vmem:[#allocation11 + $0x48] sm:$0xff]   ;;  %v1575_v44 = vld [vmem:[#allocation11 + $0x50] sm:$0xff]   ;;  %v452_v5 = vsub.s32 0, %v451_v4  ;;  %v460_v6 = vsub.s32 2, %v451_v4  ;;  %v456_v8 = vsub.s32 1, %v451_v4  ;;  %s2251_s22 = scalar_lea.hbm %s2332_s7, %s1353_s9  ;;  %s2258_s13 = scalar_lea.hbm %s2333_s8, %s1354_s23 }
  0xdf   : > { %v1568_v36 = vld [vmem:[#allocation8] sm:$0xff]   ;;  %v1572_v41 = vld [vmem:[#allocation8 + $0x8] sm:$0xff]   ;;  %v1574_v43 = vld [vmem:[#allocation8 + $0x50] sm:$0xff]   ;;  %v464_v9 = vsub.s32 3, %v451_v4  ;;  %s1092_s19 = sshll.u32 %s405_s25, 4  ;;  %s2245_s10 = scalar_lea.vmem [#allocation15], %s1284_s12  ;;  %s2253_s19 = int_to_ptr.vmem [resolvable:$true] %s1092_s19 }
  0xe0   : > { %637 = vmatpush1.bf16.msra.mxu0 %v1540_v15  ;;  %678 = vmatpush1.bf16.msra.mxu1 %v1541_v16  ;;  %v1569_v38 = vld [vmem:[#allocation11] sm:$0xff]   ;;  %v1573_v42 = vld [vmem:[#allocation11 + $0x8] sm:$0xff]   ;;  %v1577_v46 = vld [vmem:[#allocation11 + $0x10] sm:$0xff]   ;;  %v453_v10 = vrot.slane %v448_v7, %v452_v5  ;;  %v461_v11 = vrot.slane %v448_v7, %v460_v6  ;;  %v457_v12 = vrot.slane %v448_v7, %v456_v8  ;;  %s1105_s1 = sshll.u32 %s2245_s10, 4  ;;  %s1074_s21 = scalar_lea.sflag [#allocation4], %s2215_s14  ;;  %s2260_s1 = int_to_ptr.vmem [resolvable:$true] %s1105_s1 }
  0xe1   : > { %638 = vmatprep.subr.bf16.mxu0 %v1542_v17  ;;  %679 = vmatprep.subr.bf16.mxu1 %v1544_v18  ;;  %v1576_v45 = vld [vmem:[#allocation8 + $0x10] sm:$0xff]   ;;  %v1579_v48 = vld [vmem:[#allocation11 + $0x58] sm:$0xff]   ;;  %v1583_v52 = vld [vmem:[#allocation11 + $0x60] sm:$0xff]   ;;  %v465_v13 = vrot.slane %v448_v7, %v464_v9  ;;  %s1796_s12 = scalar_lea.vmem %s2253_s19, 128  ;;  %p2355_p5 = scmp.ne.s32.totalorder %s2345_s16, 0 }
  0xe2   : > { %v1580_v49 = vld [vmem:[#allocation8 + $0x18] sm:$0xff]   ;;  %v1582_v51 = vld [vmem:[#allocation8 + $0x60] sm:$0xff]   ;;  %v1586_v55 = vld [vmem:[#allocation8 + $0x68] sm:$0xff]   ;;  %p1797_p6 = scmp.ne.s32.totalorder %s2253_s19, %s1796_s12  ;;  %s1920_s9 = smov [#allocation14]  }
  0xe3   : > { %v1581_v50 = vld [vmem:[#allocation11 + $0x18] sm:$0xff]   ;;  %v1585_v54 = vld [vmem:[#allocation11 + $0x20] sm:$0xff]   ;;  %v1587_v56 = vld [vmem:[#allocation11 + $0x68] sm:$0xff]   ;;  %s1800_s26 = sshll.u32 %s1920_s9, 4  ;;  %s1801_s26 = int_to_ptr.vmem [resolvable:$false] %s1800_s26 }
  0xe4   : > { %639 = vmatpush1.bf16.msra.mxu0 %v1546_v19  ;;  %680 = vmatpush1.bf16.msra.mxu1 %v1547_v20  ;;  %v1584_v53 = vld [vmem:[#allocation8 + $0x20] sm:$0xff]   ;;  %v1588_v57 = vld [vmem:[#allocation8 + $0x28] sm:$0xff]   ;;  %v1590_v59 = vld [vmem:[#allocation8 + $0x70] sm:$0xff]   ;;  %p1798_p10 = pnand %p1797_p6, %p2355_p5  ;;  %s1802_s20 = scalar_lea.vmem %s1801_s26, 256 }
  0xe5   : > { %640 = vmatprep.subr.bf16.mxu0 %v1548_v21  ;;  %681 = vmatprep.subr.bf16.mxu1 %v1550_v22  ;;  %v1589_v58 = vld [vmem:[#allocation11 + $0x28] sm:$0xff]   ;;  %v1591_v60 = vld [vmem:[#allocation11 + $0x70] sm:$0xff]   ;;  %v1595_v0 = vld [vmem:[#allocation11 + $0x78] sm:$0xff]   ;;  %p1803_p11 = scmp.lt.s32.totalorder %s2253_s19, %s1801_s26  ;;  %p1804_p12 = scmp.lt.s32.totalorder %s1802_s20, %s1796_s12 }
  0xe6   : > { %v1592_v61 = vld [vmem:[#allocation8 + $0x30] sm:$0xff]   ;;  %v1594_v63 = vld [vmem:[#allocation8 + $0x78] sm:$0xff]   ;;  %p1799_p1 = pneg %p1798_p10 }
  0xe7   : > { %v1593_v62 = vld [vmem:[#allocation11 + $0x30] sm:$0xff]   ;;  %v1597_v2 = vld [vmem:[#allocation11 + $0x38] sm:$0xff]   ;;  %p1805_p13 = por %p1804_p12, %p1803_p11 }
  0xe8   : > { %641 = vmatpush1.bf16.msra.mxu0 %v1552_v23  ;;  %682 = vmatpush1.bf16.msra.mxu1 %v1553_v24  ;;  %v1596_v1 = vld [vmem:[#allocation8 + $0x38] sm:$0xff]  }
  0xe9   : > { %642 = vmatprep.subr.bf16.mxu0 %v1554_v25  ;;  %683 = vmatprep.subr.bf16.mxu1 %v1556_v26  ;;  %p1806_p3 = pnand %p1805_p13, %p1799_p1 }
  0xec   : > { %643 = vmatpush1.bf16.msra.mxu0 %v1558_v27  ;;  %684 = vmatpush1.bf16.msra.mxu1 %v1559_v28 }
  0xed   : > { %644 = vmatprep.subr.bf16.mxu0 %v1560_v29  ;;  %685 = vmatprep.subr.bf16.mxu1 %v1562_v30 }
  0xf0   : > { %645 = vmatpush1.bf16.msra.mxu0 %v1564_v31  ;;  %686 = vmatpush1.bf16.msra.mxu1 %v1565_v32 }
  0xf1   : > { %1357 = vmatprep.subr.bf16.mxu0 %v1566_v34  ;;  %1379 = vmatprep.subr.bf16.mxu1 %v1567_v35 }
  0xf3   : > { %663 = vmatmul.mubr.bf16.vlgmr.msra.gmra.mrb[0].mxu0 %v415_v37  ;;  %704 = vmatmul.mubr.bf16.vlgmr.msra.gmra.mrb[0].mxu1 %v415_v37 }
  0xf4   : > { %1358 = vmatpush3.bf16.msra.mxu0 %v1568_v36  ;;  %1380 = vmatpush3.bf16.msra.mxu1 %v1569_v38  ;;  %v1317_v36 = vld [vmem:[#allocation10] ss:$0 sm:$0xff]  ;;  %v1334_v38 = vld [vmem:[#allocation13] ss:$0 sm:$0xff] }
  0xf5   : > { %1359 = vmatprep.subr.bf16.mxu0 %v1570_v39  ;;  %1381 = vmatprep.subr.bf16.mxu1 %v1571_v40 }
  0xf8   : > { %1360 = vmatpush3.bf16.msra.mxu0 %v1572_v41  ;;  %1382 = vmatpush3.bf16.msra.mxu1 %v1573_v42 }
  0xf9   : > { %1361 = vmatprep.subr.bf16.mxu0 %v1574_v43  ;;  %1383 = vmatprep.subr.bf16.mxu1 %v1575_v44 }
  0xfc   : > { %1362 = vmatpush3.bf16.msra.mxu0 %v1576_v45  ;;  %1384 = vmatpush3.bf16.msra.mxu1 %v1577_v46 }
  0xfd   : > { %1363 = vmatprep.subr.bf16.mxu0 %v1578_v47  ;;  %1385 = vmatprep.subr.bf16.mxu1 %v1579_v48 }
 0x100   : > { %1364 = vmatpush3.bf16.msra.mxu0 %v1580_v49  ;;  %1386 = vmatpush3.bf16.msra.mxu1 %v1581_v50 }
 0x101   : > { %1365 = vmatprep.subr.bf16.mxu0 %v1582_v51  ;;  %1387 = vmatprep.subr.bf16.mxu1 %v1583_v52 }
 0x104   : > { %1366 = vmatpush3.bf16.msra.mxu0 %v1584_v53  ;;  %1388 = vmatpush3.bf16.msra.mxu1 %v1585_v54 }
 0x105   : > { %1367 = vmatprep.subr.bf16.mxu0 %v1586_v55  ;;  %1389 = vmatprep.subr.bf16.mxu1 %v1587_v56 }
 0x108   : > { %1368 = vmatpush3.bf16.msra.mxu0 %v1588_v57  ;;  %1390 = vmatpush3.bf16.msra.mxu1 %v1589_v58 }
 0x109   : > { %1369 = vmatprep.subr.bf16.mxu0 %v1590_v59  ;;  %1391 = vmatprep.subr.bf16.mxu1 %v1591_v60 }
 0x10c   : > { %1370 = vmatpush3.bf16.msra.mxu0 %v1592_v61  ;;  %1392 = vmatpush3.bf16.msra.mxu1 %v1593_v62 }
 0x10d   : > { %1371 = vmatprep.subr.bf16.mxu0 %v1594_v63  ;;  %1393 = vmatprep.subr.bf16.mxu1 %v1595_v0 }
 0x110   : > { %1372 = vmatpush3.bf16.msra.mxu0 %v1596_v1  ;;  %1394 = vmatpush3.bf16.msra.mxu1 %v1597_v2 }
 0x1c6   : > { %v664_v14 = vpop.f32.mrb[0].mxu0  ;;  %v705_v15 = vpop.f32.mrb[0].mxu1 }
 0x1c7   : > { %v665_v16 = vadd.f32 %v664_v14, %v453_v10  ;;  %v706_v17 = vadd.f32 %v705_v15, %v461_v11  ;;  %v666_v18 = vpop.f32.mrb[1].mxu0  ;;  %v707_v19 = vpop.f32.mrb[1].mxu1 }
 0x1c8   : > { %v667_v20 = vadd.f32 %v666_v18, %v457_v12  ;;  %v708_v21 = vadd.f32 %v707_v19, %v465_v13  ;;  %v668_v22 = vpop.f32.mrb[2].mxu0  ;;  %v709_v23 = vpop.f32.mrb[2].mxu1 }
 0x1c9   : > { %v712_v24 = vmax.f32 %v665_v16, 0.0  ;;  %v714_v25 = vmax.f32 %v706_v17, 0.0  ;;  %v669_v26 = vpop.f32.mrb[3].mxu0  ;;  %v710_v27 = vpop.f32.mrb[3].mxu1 }
 0x1ca   : > { %v713_v28 = vmax.f32 %v667_v20, 0.0  ;;  %v715_v29 = vmax.f32 %v708_v21, 0.0 }
 0x1cb   : > { %v716_v30 = vpack.c.bf16 %v712_v24, %v712_v24  ;;  %v718_v33 = vpack.c.bf16 %v714_v25, %v714_v25 }
 0x1cc   : > { %v717_v31 = vpack.c.bf16 %v713_v28, %v713_v28  ;;  %v719_v32 = vpack.c.bf16 %v715_v29, %v715_v29 }
 0x1ce   : > { %887 = vmatprep.mubr.bf16.mxu0 %v717_v31  ;;  %1062 = vmatprep.mubr.bf16.mxu1 %v719_v32 }
 0x1cf   : > { %888 = vmatmul.mubr.bf16.vlgmr.msra.gmra.mrb[4].mxu0 %v716_v30  ;;  %1063 = vmatmul.mubr.bf16.vlgmr.msra.gmra.mrb[4].mxu1 %v718_v33 }
 0x2a2   : > { %v1373_v34 = vpop.f32.mrb[4].mxu0  ;;  %v1395_v35 = vpop.f32.mrb[4].mxu1 }
 0x2a3   : > { %v1374_v37 = vpop.f32.mrb[5].mxu0  ;;  %v1396_v39 = vpop.f32.mrb[5].mxu1 }
 0x2a4   : > { %v1375_v40 = vadd.f32 %v1374_v37, %v1373_v34  ;;  %v1397_v41 = vadd.f32 %v1396_v39, %v1395_v35  ;;  %v1376_v42 = vpop.f32.mrb[6].mxu0  ;;  %v1398_v43 = vpop.f32.mrb[6].mxu1 }
 0x2a5   : > { %v1377_v44 = vpop.f32.mrb[7].mxu0  ;;  %v1399_v45 = vpop.f32.mrb[7].mxu1 }
 0x2a6   : > { %v890_v46 = vadd.f32 %v1375_v40, %v1317_v36  ;;  %v1065_v47 = vadd.f32 %v1397_v41, %v1334_v38 }
 0x2a8   : > { %v1071_v48 = vpack.c.bf16 %v1065_v47, %v1065_v47  ;;  %1070 = vst [vmem:[%s405_s25] sm:$0xff] %v890_v46 }
 0x2a9   : > { %1809 = shalt.err (!%p1806_p3)
}
 0x2aa   : > { %s1810_s25 = scalar_lea.hbm %s2251_s22, 128  ;;  %s1814_s11 = scalar_lea.hbm %s2332_s7, 256 }
 0x2ab   : > { %p1811_p7 = scmp.ne.s32.totalorder %s2251_s22, %s1810_s25  ;;  %p1815_p8 = scmp.lt.u32.totalorder %s2251_s22, %s2332_s7 }
 0x2ac   : > { %p1816_p0 = scmp.lt.u32.totalorder %s1814_s11, %s1810_s25  ;;  %p1818_p6 = scmp.lt.u32.totalorder %s1810_s25, %s2251_s22 }
 0x2ad   : > { %p1812_p9 = pnand %p1811_p7, %p2355_p5 }
 0x2ae   : > { %p1817_p2 = por %p1816_p0, %p1815_p8 }
 0x2af   : > { %p1813_p4 = pneg %p1812_p9 }
 0x2b0   : > { %p1819_p10 = por %p1818_p6, %p1817_p2 }
 0x2b2   : > { %p1820_p1 = pnand %p1819_p10, %p1813_p4 }
 0x2b4   : > { %1823 = shalt.err (!%p1820_p1)
}
 0x2b5   : > { %1427 = dma.vmem_to_hbm [thread:$0]  (%p2355_p5), %s2253_s19, 128, %s2251_s22, %s1074_s21   ;;  %1072 = vst [vmem:[%s2245_s10] sm:$0xf] %v1071_v48 }
 0x2b6   : > { %s1079_s12 = scalar_lea.sflag [#allocation16], %s2215_s14  ;;  %s1824_s20 = scalar_lea.vmem %s2260_s1, 64 }
 0x2b7   : > { %p1825_p11 = scmp.ne.s32.totalorder %s2260_s1, %s1824_s20  ;;  %s1921_s25 = smov [#allocation15]  }
 0x2b8   : > { %s1828_s23 = sshll.u32 %s1921_s25, 4  ;;  %s1829_s23 = int_to_ptr.vmem [resolvable:$false] %s1828_s23 }
 0x2b9   : > { %p1826_p12 = pnand %p1825_p11, %p2355_p5  ;;  %s1830_s24 = scalar_lea.vmem %s1829_s23, 128 }
 0x2ba   : > { %p1831_p3 = scmp.lt.s32.totalorder %s2260_s1, %s1829_s23  ;;  %p1832_p7 = scmp.lt.s32.totalorder %s1830_s24, %s1824_s20 }
 0x2bb   : > { %p1827_p13 = pneg %p1826_p12 }
 0x2bc   : > { %p1833_p9 = por %p1832_p7, %p1831_p3 }
 0x2be   : > { %p1834_p4 = pnand %p1833_p9, %p1827_p13 }
 0x2c0   : > { %1837 = shalt.err (!%p1834_p4)
}
 0x2c1   : > { %s1838_s14 = scalar_lea.hbm %s2258_s13, 64  ;;  %s1842_s22 = scalar_lea.hbm %s2333_s8, 128 }
 0x2c2   : > { %p1839_p8 = scmp.ne.s32.totalorder %s2258_s13, %s1838_s14  ;;  %p1843_p6 = scmp.lt.u32.totalorder %s2258_s13, %s2333_s8 }
 0x2c3   : > { %p1844_p10 = scmp.lt.u32.totalorder %s1842_s22, %s1838_s14  ;;  %p1846_p11 = scmp.lt.u32.totalorder %s1838_s14, %s2258_s13 }
 0x2c4   : > { %p1840_p0 = pnand %p1839_p8, %p2355_p5 }
 0x2c5   : > { %p1845_p1 = por %p1844_p10, %p1843_p6 }
 0x2c6   : > { %p1841_p2 = pneg %p1840_p0 }
 0x2c7   : > { %p1847_p12 = por %p1846_p11, %p1845_p1 }
 0x2c9   : > { %p1848_p13 = pnand %p1847_p12, %p1841_p2 }
 0x2cb   : > { %1851 = shalt.err (!%p1848_p13)
}
 0x2cc   : > { %1428 = dma.vmem_to_hbm [thread:$0]  (%p2355_p5), %s2260_s1, 64, %s2258_s13, %s1079_s12  }
 0x2cd PF: > { %s1117_s9 = sand.u32 1, %s1894_s27   ;;  %p2356_p3 = scmp.ne.s32.totalorder %s2346_s18, 0 }
 0x2ce   : > { %p2357_p7 = scmp.ge.s32.totalorder %s1906_s30, 2  ;;  %s1118_s26 = scalar_lea.sflag [#allocation4], %s1117_s9 }
 0x2d0   : > { %p1455_p9 = pnand %p2357_p7, %p2356_p3 }
 0x2d2   : > { %1885 = dma.done.wait (!%p1455_p9), %s1118_s26, 128  }
 0x2d3   : > { %1887 = vsyncadd (!%p1455_p9), %s1118_s26, 4294967168  ;;  %s1127_s20 = scalar_lea.sflag [#allocation16], %s1117_s9 }
 0x2d4   : > { %1889 = dma.done.wait (!%p1455_p9), %s1127_s20, 64  }
 0x2d5   : > { %1891 = vsyncadd (!%p1455_p9), %s1127_s20, 4294967232  ;;  %p28_p5 = scmp.ge.s32.totalorder %s2139_s15, 4   ;;  %s2358_s27 = smov %s1898_s28 }
 0x2d6   : > { %s2359_s28 = smov %s1902_s29  ;;  %s2360_s29 = smov %s2150_s17 }
 0x2d7   : > { %s2361_s30 = smov %s2139_s15  ;;  %30 = sbr.rel (!%p28_p5) target bundleno = 12 (0xc), region = 134 }
 0x2de   :  { %1132 = vsyncpa [#allocation3], 1 }
 0x2df   :  { %1134 = vsyncpa [#allocation3 + $0x1], 1 }
 0x2e0   :  { %1135 = vsyncpa [#allocation6], 1 }
 0x2e1   :  { %1136 = vsyncpa [#allocation9], 1 }
 0x2e2   :  { %1137 = vsyncpa [#allocation12], 1 }
 0x2e3   :  { %1138 = vsyncpa [#allocation4], 1 }
 0x2e4   :  { %1140 = vsyncpa [#allocation4 + $0x1], 1 }
 0x2e5   :  { %1141 = vsyncpa [#allocation16], 1 }
 0x2e6   :  { %1143 = vsyncpa [#allocation16 + $0x1], 1 }

// kernel: step.2
= control target key start
LH: loop header
LB: loop body
LE: loop exit
PB: predicated region body
PF: predicated region fallthrough
CT: control target
= control target key end

     0   :  { %s2431_s0 = inlined_call_operand.<no memory space> [shape: f32[1], index: 0, kind: input, shape index: {}]   ;;  %s2432_s1 = inlined_call_operand.hbm [shape: f32[1,256], index: 1, kind: input, shape index: {}]   ;;  %s2433_s2 = inlined_call_operand.hbm [shape: f32[1,128], index: 2, kind: input, shape index: {}]   ;;  %s2434_s3 = inlined_call_operand.hbm [shape: f32[128,256], index: 3, kind: input, shape index: {}]   ;;  %s2435_s4 = inlined_call_operand.hbm [shape: f32[256,128], index: 4, kind: input, shape index: {}]   ;;  %s2436_s5 = inlined_call_operand.hbm [shape: f32[1,256], index: 5, kind: input, shape index: {}, may-alias: {5,9}]   ;;  %s2437_s6 = inlined_call_operand.hbm [shape: f32[1,128], index: 6, kind: input, shape index: {}, may-alias: {6,10}]   ;;  %s2438_s7 = inlined_call_operand.hbm [shape: f32[128,256], index: 7, kind: input, shape index: {}, may-alias: {7,11}]   ;;  %s2439_s8 = inlined_call_operand.hbm [shape: f32[256,128], index: 8, kind: input, shape index: {}, may-alias: {8,12}]   ;;  %s2440_s9 = inlined_call_operand.hbm [shape: f32[1,256], index: 9, kind: output, shape index: {0}, may-alias: {5,9}]   ;;  %s2441_s10 = inlined_call_operand.hbm [shape: f32[1,128], index: 10, kind: output, shape index: {1}, may-alias: {6,10}]   ;;  %s2442_s11 = inlined_call_operand.hbm [shape: f32[128,256], index: 11, kind: output, shape index: {2}, may-alias: {7,11}]   ;;  %s2443_s12 = inlined_call_operand.hbm [shape: f32[256,128], index: 12, kind: output, shape index: {3}, may-alias: {8,12}]   ;;  %s2444_s13 = inlined_call_operand.hbm [shape: bf16[1,256], index: 13, kind: output, shape index: {4}]   ;;  %s2445_s14 = inlined_call_operand.hbm [shape: bf16[1,128], index: 14, kind: output, shape index: {5}]   ;;  %s2446_s15 = inlined_call_operand.hbm [shape: bf16[128,256], index: 15, kind: output, shape index: {6}]   ;;  %s2447_s16 = inlined_call_operand.hbm [shape: bf16[256,128], index: 16, kind: output, shape index: {7}]  }
   0x1   :  { %2468 = sst [smem:[#allocation59_spill]] %s2431_s0 }
   0x2   :  { %23 = vsyncpa [#allocation4], 0 }
   0x3   :  { %24 = vsyncpa [#allocation7], 0 }
   0x4   :  { %25 = vsyncpa [#allocation10], 0 }
   0x5   :  { %26 = vsyncpa [#allocation13], 0 }
   0x6   :  { %27 = vsyncpa [#allocation16], 0 }
   0x7   :  { %28 = vsyncpa [#allocation5], 0 }
   0x8   :  { %29 = vsyncpa [#allocation19], 0 }
   0x9   :  { %30 = vsyncpa [#allocation22], 0 }
   0xa   :  { %31 = vsyncpa [#allocation25], 0 }
   0xb   :  { %32 = vsyncpa [#allocation28], 0  ;;  %s1576_s21 = smov [#allocation6]   ;;  %s1577_s23 = smov [#allocation9]  }
   0xc   :  { %s51_s22 = sshll.u32 %s1576_s21, 4  ;;  %s72_s24 = sshll.u32 %s1577_s23, 4  ;;  %s52_s22 = int_to_ptr.vmem [resolvable:$true] %s51_s22  ;;  %s1684_s24 = int_to_ptr.vmem [resolvable:$true] %s72_s24 }
   0xd   :  { %s1204_s27 = scalar_lea.hbm %s2433_s2, 16 }
   0xe   :  { %p1205_p0 = scmp.ne.s32.totalorder %s2433_s2, %s1204_s27  ;;  %p1208_p1 = scmp.lt.u32.totalorder %s1204_s27, %s2433_s2 }
  0x10   :  { %p1210_p2 = pnand %p1208_p1, %p1205_p0 }
  0x12   :  { %1213 = shalt.err (!%p1210_p2)
}
  0x13   :  { %s1214_s17 = scalar_lea.vmem %s52_s22, 16  ;;  %s1218_s18 = scalar_lea.vmem %s52_s22, 32 }
  0x14   :  { %p1215_p3 = scmp.ne.s32.totalorder %s52_s22, %s1214_s17  ;;  %p1219_p4 = scmp.lt.s32.totalorder %s52_s22, %s52_s22 }
  0x15   :  { %p1220_p5 = scmp.lt.s32.totalorder %s1218_s18, %s1214_s17 }
  0x17   :  { %p1221_p6 = por %p1220_p5, %p1219_p4 }
  0x19   :  { %p1222_p7 = pnand %p1221_p6, %p1215_p3 }
  0x1b   :  { %1225 = shalt.err (!%p1222_p7)
}
  0x1c   :  { %54 = dma.hbm_to_vmem [thread:$0]  %s2433_s2, 16, %s52_s22, [#allocation7]  }
  0x1d   :  { %s1226_s25 = scalar_lea.hbm %s2435_s4, 4096 }
  0x1e   :  { %p1227_p8 = scmp.ne.s32.totalorder %s2435_s4, %s1226_s25  ;;  %p1230_p9 = scmp.lt.u32.totalorder %s1226_s25, %s2435_s4 }
  0x20   :  { %p1232_p10 = pnand %p1230_p9, %p1227_p8 }
  0x22   :  { %1235 = shalt.err (!%p1232_p10)
}
  0x23   :  { %s1236_s30 = scalar_lea.vmem %s1684_s24, 4096  ;;  %p1241_p12 = scmp.lt.s32.totalorder %s1684_s24, %s1684_s24 }
  0x24   :  { %p1237_p11 = scmp.ne.s32.totalorder %s1684_s24, %s1236_s30  ;;  %p1242_p13 = scmp.lt.s32.totalorder %s1236_s30, %s1236_s30 }
  0x26   :  { %p1243_p0 = por %p1242_p13, %p1241_p12 }
  0x28   :  { %p1244_p1 = pnand %p1243_p0, %p1237_p11 }
  0x2a   :  { %1247 = shalt.err (!%p1244_p1)
}
  0x2b   :  { %s1578_s2 = smov 128   ;;  %s1579_s22 = smov 8  }
  0x2c   :  { %78 = dma.hbm_to_vmem [thread:$0]  %s2435_s4, 4096, %s1684_s24, [#allocation10], %s1578_s2, %s1578_s2, %s1579_s22  }
  0x2d   :  { %s1580_s18 = smov [#allocation12]   ;;  %s1581_s20 = smov [#allocation3]  }
  0x2e   :  { %s95_s19 = sshll.u32 %s1580_s18, 4  ;;  %s41_s21 = sshll.u32 %s1581_s20, 4  ;;  %s96_s19 = int_to_ptr.vmem [resolvable:$true] %s95_s19  ;;  %s42_s21 = int_to_ptr.vmem [resolvable:$true] %s41_s21 }
  0x2f   :  { %s1248_s26 = scalar_lea.hbm %s2437_s6, 16 }
  0x30   :  { %p1249_p2 = scmp.ne.s32.totalorder %s2437_s6, %s1248_s26  ;;  %p1252_p3 = scmp.lt.u32.totalorder %s1248_s26, %s2437_s6 }
  0x32   :  { %p1254_p4 = pnand %p1252_p3, %p1249_p2 }
  0x34   :  { %1257 = shalt.err (!%p1254_p4)
}
  0x35   :  { %s1258_s4 = scalar_lea.vmem %s96_s19, 16  ;;  %s1262_s24 = scalar_lea.vmem %s96_s19, 32 }
  0x36   :  { %p1259_p5 = scmp.ne.s32.totalorder %s96_s19, %s1258_s4  ;;  %p1263_p6 = scmp.lt.s32.totalorder %s96_s19, %s96_s19 }
  0x37   :  { %p1264_p7 = scmp.lt.s32.totalorder %s1262_s24, %s1258_s4 }
  0x39   :  { %p1265_p8 = por %p1264_p7, %p1263_p6 }
  0x3b   :  { %p1266_p9 = pnand %p1265_p8, %p1259_p5 }
  0x3d   :  { %1269 = shalt.err (!%p1266_p9)
}
  0x3e   :  { %98 = dma.hbm_to_vmem [thread:$0]  %s2437_s6, 16, %s96_s19, [#allocation13]  }
  0x3f   :  { %s1270_s23 = scalar_lea.hbm %s2432_s1, 32 }
  0x40   :  { %p1271_p10 = scmp.ne.s32.totalorder %s2432_s1, %s1270_s23  ;;  %p1274_p11 = scmp.lt.u32.totalorder %s1270_s23, %s2432_s1 }
  0x42   :  { %p1276_p12 = pnand %p1274_p11, %p1271_p10 }
  0x44   :  { %1279 = shalt.err (!%p1276_p12)
}
  0x45   :  { %s1280_s29 = scalar_lea.vmem %s42_s21, 32  ;;  %p1285_p0 = scmp.lt.s32.totalorder %s42_s21, %s42_s21 }
  0x46   :  { %p1281_p13 = scmp.ne.s32.totalorder %s42_s21, %s1280_s29  ;;  %p1286_p1 = scmp.lt.s32.totalorder %s1280_s29, %s1280_s29 }
  0x48   :  { %p1287_p2 = por %p1286_p1, %p1285_p0 }
  0x4a   :  { %p1288_p3 = pnand %p1287_p2, %p1281_p13 }
  0x4c   :  { %1291 = shalt.err (!%p1288_p3)
}
  0x4d   :  { %44 = dma.hbm_to_vmem [thread:$0]  %s2432_s1, 32, %s42_s21, [#allocation4]  }
  0x4e   :  { %s1582_s30 = smov [#allocation8]   ;;  %s1292_s17 = scalar_lea.hbm %s2434_s3, 4096 }
  0x4f   :  { %s60_s4 = sshll.u32 %s1582_s30, 4  ;;  %p1293_p4 = scmp.ne.s32.totalorder %s2434_s3, %s1292_s17  ;;  %s61_s4 = int_to_ptr.vmem [resolvable:$true] %s60_s4 }
  0x50   :  { %p1296_p5 = scmp.lt.u32.totalorder %s1292_s17, %s2434_s3 }
  0x52   :  { %p1298_p6 = pnand %p1296_p5, %p1293_p4 }
  0x54   :  { %1301 = shalt.err (!%p1298_p6)
}
  0x55   :  { %s1302_s26 = scalar_lea.vmem %s61_s4, 4096  ;;  %p1307_p8 = scmp.lt.s32.totalorder %s61_s4, %s61_s4 }
  0x56   :  { %p1303_p7 = scmp.ne.s32.totalorder %s61_s4, %s1302_s26  ;;  %p1308_p9 = scmp.lt.s32.totalorder %s1302_s26, %s1302_s26 }
  0x58   :  { %p1309_p10 = por %p1308_p9, %p1307_p8 }
  0x5a   :  { %p1310_p11 = pnand %p1309_p10, %p1303_p7 }
  0x5c   :  { %1313 = shalt.err (!%p1310_p11)
}
  0x5d   :  { %s1583_s1 = smov 256   ;;  %s1584_s21 = smov 16  }
  0x5e   :  { %66 = dma.hbm_to_vmem [thread:$0]  %s2434_s3, 4096, %s61_s4, [#allocation7], %s1583_s1, %s1583_s1, %s1584_s21  }
  0x5f   :  { %s1585_s29 = smov [#allocation11]   ;;  %s1586_s19 = smov [#allocation14]  }
  0x60   :  { %s85_s6 = sshll.u32 %s1585_s29, 4  ;;  %s104_s30 = sshll.u32 %s1586_s19, 4  ;;  %s86_s6 = int_to_ptr.vmem [resolvable:$true] %s85_s6  ;;  %s105_s30 = int_to_ptr.vmem [resolvable:$true] %s104_s30 }
  0x61   :  { %s1314_s17 = scalar_lea.hbm %s2436_s5, 32 }
  0x62   :  { %p1315_p12 = scmp.ne.s32.totalorder %s2436_s5, %s1314_s17  ;;  %p1318_p13 = scmp.lt.u32.totalorder %s1314_s17, %s2436_s5 }
  0x64   :  { %p1320_p0 = pnand %p1318_p13, %p1315_p12 }
  0x66   :  { %1323 = shalt.err (!%p1320_p0)
}
  0x67   :  { %s1324_s3 = scalar_lea.vmem %s86_s6, 32  ;;  %p1329_p2 = scmp.lt.s32.totalorder %s86_s6, %s86_s6 }
  0x68   :  { %p1325_p1 = scmp.ne.s32.totalorder %s86_s6, %s1324_s3  ;;  %p1330_p3 = scmp.lt.s32.totalorder %s1324_s3, %s1324_s3 }
  0x6a   :  { %p1331_p4 = por %p1330_p3, %p1329_p2 }
  0x6c   :  { %p1332_p5 = pnand %p1331_p4, %p1325_p1 }
  0x6e   :  { %1335 = shalt.err (!%p1332_p5)
}
  0x6f   :  { %88 = dma.hbm_to_vmem [thread:$0]  %s2436_s5, 32, %s86_s6, [#allocation10]  }
  0x70   :  { %s1336_s29 = scalar_lea.hbm %s2438_s7, 4096 }
  0x71   :  { %p1337_p6 = scmp.ne.s32.totalorder %s2438_s7, %s1336_s29  ;;  %p1340_p7 = scmp.lt.u32.totalorder %s1336_s29, %s2438_s7 }
  0x73   :  { %p1342_p8 = pnand %p1340_p7, %p1337_p6 }
  0x75   :  { %1345 = shalt.err (!%p1342_p8)
}
  0x76   :  { %s1346_s18 = scalar_lea.vmem %s105_s30, 4096  ;;  %p1351_p10 = scmp.lt.s32.totalorder %s105_s30, %s105_s30 }
  0x77   :  { %p1347_p9 = scmp.ne.s32.totalorder %s105_s30, %s1346_s18  ;;  %p1352_p11 = scmp.lt.s32.totalorder %s1346_s18, %s1346_s18 }
  0x79   :  { %p1353_p12 = por %p1352_p11, %p1351_p10 }
  0x7b   :  { %p1354_p13 = pnand %p1353_p12, %p1347_p9 }
  0x7d   :  { %1357 = shalt.err (!%p1354_p13)
}
  0x7e   :  { %110 = dma.hbm_to_vmem [thread:$0]  %s2438_s7, 4096, %s105_s30, [#allocation13], %s1583_s1, %s1583_s1, %s1584_s21  }
  0x7f   :  { %s1587_s20 = smov [#allocation15]   ;;  %s1358_s4 = scalar_lea.hbm %s2439_s8, 4096 }
  0x80   :  { %s116_s23 = sshll.u32 %s1587_s20, 4  ;;  %p1359_p0 = scmp.ne.s32.totalorder %s2439_s8, %s1358_s4  ;;  %s117_s23 = int_to_ptr.vmem [resolvable:$true] %s116_s23 }
  0x81   :  { %p1362_p1 = scmp.lt.u32.totalorder %s1358_s4, %s2439_s8 }
  0x83   :  { %p1364_p2 = pnand %p1362_p1, %p1359_p0 }
  0x85   :  { %1367 = shalt.err (!%p1364_p2)
}
  0x86   :  { %s1368_s19 = scalar_lea.vmem %s117_s23, 4096  ;;  %p1373_p4 = scmp.lt.s32.totalorder %s117_s23, %s117_s23 }
  0x87   :  { %p1369_p3 = scmp.ne.s32.totalorder %s117_s23, %s1368_s19  ;;  %p1374_p5 = scmp.lt.s32.totalorder %s1368_s19, %s1368_s19 }
  0x89   :  { %p1375_p6 = por %p1374_p5, %p1373_p4 }
  0x8b   :  { %p1376_p7 = pnand %p1375_p6, %p1369_p3 }
  0x8d   :  { %1379 = shalt.err (!%p1376_p7)
}
  0x8e   :  { %122 = dma.hbm_to_vmem [thread:$0]  %s2439_s8, 4096, %s117_s23, [#allocation16], %s1578_s2, %s1578_s2, %s1579_s22  }
  0x8f   :  { %1556 = dma.done.wait [#allocation4], 32  }
  0x90   :  { %1557 = vsyncadd [#allocation4], 4294967264 }
  0x91   :  { %1558 = dma.done.wait [#allocation7], 4112  }
  0x92   :  { %1559 = vsyncadd [#allocation7], 4294963184 }
  0x93   :  { %1560 = dma.done.wait [#allocation10], 4128  }
  0x94   :  { %1561 = vsyncadd [#allocation10], 4294963168 }
  0x95   :  { %1562 = dma.done.wait [#allocation13], 4112  }
  0x96   :  { %1563 = vsyncadd [#allocation13], 4294963184 }
  0x97   :  { %1564 = dma.done.wait [#allocation16], 4096  }
  0x98   :  { %1565 = vsyncadd [#allocation16], 4294963200  ;;  %v155_v0 = vlaneseq  ;;  %v1588_v1 = vmov 1966171168   ;;  %vm191_vm0 = vcmask 1040384   ;;  %s2469_s17 = sld [smem:[#allocation59_spill]] }
  0x99   :  { %v177_v2 = vunpack.c.l.s4 %v1588_v1  ;;  %vm192_vm1 = vsmask.f32 256  ;;  %v201_v4 = vld [vmem:[#allocation6] sm:$0x1]  ;;  %v202_v5 = vld [vmem:[#allocation12] sm:$0x1] }
  0x9a   :  { %v1803_v3 = vshrl.u32 %v155_v0, 7  ;;  %vm1805_vm2 = vmand %vm191_vm0, %vm192_vm1  ;;  %v203_v8 = vsub.f32 %v201_v4, %v202_v5  ;;  %v515_v9 = vld [vmem:[#allocation9] sm:$0xff]  ;;  %v516_v11 = vld [vmem:[#allocation9 + $0x8] sm:$0xff]  ;;  %s1589_s8 = smov [#allocation18]   ;;  %s1590_s6 = smov [#allocation24]  }
  0x9b   :  { %v178_v7 = vunpack.c.0.s8 %v177_v2  ;;  %v547_v10 = vld [vmem:[#allocation15] sm:$0xff]  ;;  %v548_v14 = vld [vmem:[#allocation15 + $0x8] sm:$0xff]  ;;  %v549_v16 = vld [vmem:[#allocation15 + $0x10] sm:$0xff]  ;;  %s883_s5 = sshll.u32 %s1589_s8, 4  ;;  %s927_s20 = sshll.u32 %s1590_s6, 4  ;;  %s1820_s5 = int_to_ptr.vmem [resolvable:$true] %s883_s5  ;;  %s1838_s20 = int_to_ptr.vmem [resolvable:$true] %s927_s20 }
  0x9c   :  { %v579_v13 = vsub.f32 %v515_v9, %v547_v10  ;;  %v517_v15 = vld [vmem:[#allocation9 + $0x10] sm:$0xff]  ;;  %v580_v18 = vsub.f32 %v516_v11, %v548_v14  ;;  %v518_v20 = vld [vmem:[#allocation9 + $0x18] sm:$0xff]  ;;  %v519_v22 = vld [vmem:[#allocation9 + $0x20] sm:$0xff]  ;;  %s1380_s23 = scalar_lea.vmem %s1820_s5, 16  ;;  %s1384_s25 = scalar_lea.vmem %s1820_s5, 32 }
  0x9d   :  { %v581_v19 = vsub.f32 %v517_v15, %v549_v16  ;;  %v550_v21 = vld [vmem:[#allocation15 + $0x18] sm:$0xff]  ;;  %v208_v24 = vld [vmem:[#allocation24] sm:$0x1]  ;;  %v552_v29 = vld [vmem:[#allocation15 + $0x28] sm:$0xff]  ;;  %v1816_v31 = vsub.s32 %v178_v7, %v1803_v3  ;;  %p1381_p8 = scmp.ne.s32.totalorder %s1820_s5, %s1380_s23  ;;  %p1385_p9 = scmp.lt.s32.totalorder %s1820_s5, %s1820_s5 }
  0x9e   :  { %s148_s18 = ssub.f32 1.0, %s2469_s17  ;;  %v582_v26 = vsub.f32 %v518_v20, %v550_v21  ;;  %v551_v27 = vld [vmem:[#allocation15 + $0x20] sm:$0xff]  ;;  %v521_v36 = vld [vmem:[#allocation9 + $0x30] sm:$0xff]  ;;  %v522_v38 = vld [vmem:[#allocation9 + $0x38] sm:$0xff]  ;;  %p1386_p10 = scmp.lt.s32.totalorder %s1384_s25, %s1380_s23 }
  0x9f   :  { %v520_v28 = vld [vmem:[#allocation9 + $0x28] sm:$0xff]  ;;  %v583_v35 = vsub.f32 %v519_v22, %v551_v27  ;;  %v553_v37 = vld [vmem:[#allocation15 + $0x30] sm:$0xff]  ;;  %v1825_v43 = vld [vmem:[#allocation15 + $0x38] sm:$0xff] }
  0xa0   :  { %v1809_v12 = vstv %s148_s18  ;;  %v584_v41 = vsub.f32 %v520_v28, %v552_v29  ;;  %v585_v42 = vsub.f32 %v521_v36, %v553_v37  ;;  %v523_v44 = vld [vmem:[#allocation9 + $0x40] sm:$0xff]  ;;  %v524_v50 = vld [vmem:[#allocation9 + $0x48] sm:$0xff]  ;;  %v1836_v52 = vld [vmem:[#allocation9 + $0x50] sm:$0xff]  ;;  %v586_v56 = vsub.f32 %v522_v38, %v1825_v43  ;;  %p1387_p11 = por %p1386_p10, %p1385_p9 }
  0xa1   :  { %v204_v17 = vmul.f32 %v203_v8, %v1809_v12  ;;  %v611_v25 = vmul.f32 %v579_v13, %v1809_v12  ;;  %v612_v33 = vmul.f32 %v580_v18, %v1809_v12  ;;  %v613_v34 = vmul.f32 %v581_v19, %v1809_v12  ;;  %v1827_v45 = vld [vmem:[#allocation15 + $0x40] sm:$0xff]  ;;  %v1834_v51 = vld [vmem:[#allocation15 + $0x48] sm:$0xff]  ;;  %v1846_v57 = vld [vmem:[#allocation15 + $0x50] sm:$0xff] }
  0xa2   :  { %v614_v40 = vmul.f32 %v582_v26, %v1809_v12  ;;  %v615_v49 = vmul.f32 %v583_v35, %v1809_v12  ;;  %v616_v54 = vmul.f32 %v584_v41, %v1809_v12  ;;  %v617_v55 = vmul.f32 %v585_v42, %v1809_v12  ;;  %v1848_v58 = vld [vmem:[#allocation9 + $0x58] sm:$0xff]  ;;  %p1388_p12 = pnand %p1387_p11, %p1381_p8 }
  0xa3   :  { %v205_v32 = vadd.f32 %v204_v17, %v202_v5  ;;  %v1822_v39 = vadd.f32 %v611_v25, %v547_v10  ;;  %v1829_v47 = vadd.f32 %v612_v33, %v548_v14  ;;  %v1831_v48 = vadd.f32 %v613_v34, %v549_v16  ;;  %v1850_v59 = vld [vmem:[#allocation15 + $0x58] sm:$0xff] }
  0xa4   :  { %v1841_v53 = vadd.f32 %v614_v40, %v550_v21 }
  0xa5   :  { %206 = vst [vmem:[#allocation18] sm:$0x1] %v205_v32  ;;  %v207_v46 = vpack.c.bf16 %v205_v32, %v205_v32  ;;  %675 = vst [vmem:[#allocation21] sm:$0xff] %v1822_v39 }
  0xa6   :  { %1391 = shalt.err (!%p1388_p12)
}
  0xa7   :  { %s1392_s26 = scalar_lea.hbm %s2441_s10, 16 }
  0xa8   :  { %p1393_p13 = scmp.ne.s32.totalorder %s2441_s10, %s1392_s26  ;;  %p1396_p0 = scmp.lt.u32.totalorder %s1392_s26, %s2441_s10 }
  0xaa   :  { %p1398_p1 = pnand %p1396_p0, %p1393_p13 }
  0xac   :  { %1401 = shalt.err (!%p1398_p1)
}
  0xad   :  { %886 = dma.vmem_to_hbm [thread:$0]  %s1820_s5, 16, %s2441_s10, [#allocation19]   ;;  %v209_v60 = vsel %vm1805_vm2, %v207_v46, %v208_v24  ;;  %676 = vst [vmem:[#allocation21 + $0x8] sm:$0xff] %v1829_v47  ;;  %677 = vst [vmem:[#allocation21 + $0x10] sm:$0xff] %v1831_v48  ;;  %v1874_v61 = vadd.f32 %v615_v49, %v551_v27  ;;  %v587_v62 = vsub.f32 %v523_v44, %v1827_v45  ;;  %v527_v1 = vld [vmem:[#allocation9 + $0x60] sm:$0xff]  ;;  %v528_v4 = vld [vmem:[#allocation9 + $0x68] sm:$0xff] }
  0xae   :  { %v588_v63 = vsub.f32 %v524_v50, %v1834_v51  ;;  %v559_v2 = vld [vmem:[#allocation15 + $0x60] sm:$0xff]  ;;  %210 = vst [vmem:[#allocation24] sm:$0x1] %v209_v60  ;;  %678 = vst [vmem:[#allocation21 + $0x18] sm:$0xff] %v1841_v53  ;;  %v1879_v5 = vadd.f32 %v616_v54, %v552_v29  ;;  %v1881_v7 = vadd.f32 %v617_v55, %v553_v37  ;;  %v560_v10 = vld [vmem:[#allocation15 + $0x68] sm:$0xff]  ;;  %s1402_s10 = scalar_lea.vmem %s1838_s20, 16  ;;  %p1407_p3 = scmp.lt.s32.totalorder %s1838_s20, %s1838_s20 }
  0xaf   :  { %v618_v8 = vmul.f32 %v586_v56, %v1809_v12  ;;  %v589_v9 = vsub.f32 %v1836_v52, %v1846_v57  ;;  %v529_v11 = vld [vmem:[#allocation9 + $0x70] sm:$0xff]  ;;  %679 = vst [vmem:[#allocation21 + $0x20] sm:$0xff] %v1874_v61  ;;  %v619_v14 = vmul.f32 %v587_v62, %v1809_v12  ;;  %v590_v16 = vsub.f32 %v1848_v58, %v1850_v59  ;;  %v530_v18 = vld [vmem:[#allocation9 + $0x78] sm:$0xff]  ;;  %v531_v20 = vld [vmem:[#allocation9 + $0x80] sm:$0xff]  ;;  %p1403_p2 = scmp.ne.s32.totalorder %s1838_s20, %s1402_s10  ;;  %s1406_s24 = scalar_lea.vmem %s1838_s20, 32 }
  0xb0   :  { %v561_v13 = vld [vmem:[#allocation15 + $0x70] sm:$0xff]  ;;  %v620_v15 = vmul.f32 %v588_v63, %v1809_v12  ;;  %v591_v17 = vsub.f32 %v527_v1, %v559_v2  ;;  %v1891_v19 = vld [vmem:[#allocation15 + $0x78] sm:$0xff]  ;;  %p1408_p4 = scmp.lt.s32.totalorder %s1406_s24, %s1402_s10 }
  0xb2   :  { %p1409_p5 = por %p1408_p4, %p1407_p3 }
  0xb4   :  { %p1410_p6 = pnand %p1409_p5, %p1403_p2 }
  0xb6   :  { %1413 = shalt.err (!%p1410_p6)
}
  0xb7   :  { %s1414_s18 = scalar_lea.hbm %s2445_s14, 16 }
  0xb8   :  { %p1415_p7 = scmp.ne.s32.totalorder %s2445_s14, %s1414_s18  ;;  %p1418_p8 = scmp.lt.u32.totalorder %s1414_s18, %s2445_s14 }
  0xba   :  { %p1420_p9 = pnand %p1418_p8, %p1415_p7 }
  0xbc   :  { %1423 = shalt.err (!%p1420_p9)
}
  0xbd   :  { %930 = dma.vmem_to_hbm [thread:$0]  %s1838_s20, 16, %s2445_s14, [#allocation25]   ;;  %680 = vst [vmem:[#allocation21 + $0x28] sm:$0xff] %v1879_v5  ;;  %681 = vst [vmem:[#allocation21 + $0x30] sm:$0xff] %v1881_v7  ;;  %v1914_v21 = vadd.f32 %v618_v8, %v1825_v43  ;;  %v621_v22 = vmul.f32 %v589_v9, %v1809_v12  ;;  %v592_v24 = vsub.f32 %v528_v4, %v560_v10  ;;  %v563_v26 = vld [vmem:[#allocation15 + $0x80] sm:$0xff]  ;;  %v564_v28 = vld [vmem:[#allocation15 + $0x88] sm:$0xff] }
  0xbe   :  { %v593_v25 = vsub.f32 %v529_v11, %v561_v13  ;;  %v532_v27 = vld [vmem:[#allocation9 + $0x88] sm:$0xff]  ;;  %v1918_v29 = vadd.f32 %v619_v14, %v1827_v45  ;;  %v1921_v32 = vadd.f32 %v620_v15, %v1834_v51  ;;  %v622_v33 = vmul.f32 %v590_v16, %v1809_v12  ;;  %v533_v35 = vld [vmem:[#allocation9 + $0x90] sm:$0xff]  ;;  %v534_v37 = vld [vmem:[#allocation9 + $0x98] sm:$0xff]  ;;  %s1591_s14 = smov [#allocation21]   ;;  %s1592_s4 = smov [#allocation17]  }
  0xbf   :  { %v623_v34 = vmul.f32 %v591_v17, %v1809_v12  ;;  %v565_v36 = vld [vmem:[#allocation15 + $0x90] sm:$0xff]  ;;  %682 = vst [vmem:[#allocation21 + $0x38] sm:$0xff] %v1914_v21  ;;  %v1927_v38 = vadd.f32 %v621_v22, %v1846_v57  ;;  %v624_v40 = vmul.f32 %v592_v24, %v1809_v12  ;;  %v594_v42 = vsub.f32 %v530_v18, %v1891_v19  ;;  %v566_v43 = vld [vmem:[#allocation15 + $0x98] sm:$0xff]  ;;  %v567_v45 = vld [vmem:[#allocation15 + $0xa0] sm:$0xff]  ;;  %s904_s20 = sshll.u32 %s1591_s14, 4  ;;  %s873_s26 = sshll.u32 %s1592_s4, 4  ;;  %s2047_s20 = int_to_ptr.vmem [resolvable:$true] %s904_s20  ;;  %s2059_s26 = int_to_ptr.vmem [resolvable:$true] %s873_s26 }
  0xc0   :  { %v625_v41 = vmul.f32 %v593_v25, %v1809_v12  ;;  %v535_v44 = vld [vmem:[#allocation9 + $0xa0] sm:$0xff]  ;;  %683 = vst [vmem:[#allocation21 + $0x40] sm:$0xff] %v1918_v29  ;;  %684 = vst [vmem:[#allocation21 + $0x48] sm:$0xff] %v1921_v32  ;;  %v1935_v46 = vadd.f32 %v622_v33, %v1850_v59  ;;  %v595_v50 = vsub.f32 %v531_v20, %v563_v26  ;;  %v536_v52 = vld [vmem:[#allocation9 + $0xa8] sm:$0xff]  ;;  %vm194_vm3 = vcmask 1041409   ;;  %s1424_s27 = scalar_lea.vmem %s2047_s20, 4096  ;;  %p1429_p11 = scmp.lt.s32.totalorder %s2047_s20, %s2047_s20 }
  0xc1   :  { %v1937_v49 = vadd.f32 %v623_v34, %v559_v2  ;;  %v596_v51 = vsub.f32 %v532_v27, %v564_v28  ;;  %v568_v54 = vld [vmem:[#allocation15 + $0xa8] sm:$0xff]  ;;  %685 = vst [vmem:[#allocation21 + $0x50] sm:$0xff] %v1927_v38  ;;  %v1940_v56 = vadd.f32 %v624_v40, %v560_v10  ;;  %v626_v58 = vmul.f32 %v594_v42, %v1809_v12  ;;  %v569_v62 = vld [vmem:[#allocation15 + $0xb0] sm:$0xff]  ;;  %v570_v8 = vld [vmem:[#allocation15 + $0xb8] sm:$0xff]  ;;  %p1425_p10 = scmp.ne.s32.totalorder %s2047_s20, %s1424_s27  ;;  %p1430_p12 = scmp.lt.s32.totalorder %s1424_s27, %s1424_s27 }
  0xc2   :  { %v537_v55 = vld [vmem:[#allocation9 + $0xb0] sm:$0xff]  ;;  %v1942_v57 = vadd.f32 %v625_v41, %v561_v13  ;;  %v597_v60 = vsub.f32 %v533_v35, %v565_v36  ;;  %v538_v63 = vld [vmem:[#allocation9 + $0xb8] sm:$0xff]  ;;  %686 = vst [vmem:[#allocation21 + $0x58] sm:$0xff] %v1935_v46  ;;  %v627_v59 = vmul.f32 %v595_v50, %v1809_v12  ;;  %v598_v2 = vsub.f32 %v534_v37, %v566_v43  ;;  %v539_v9 = vld [vmem:[#allocation9 + $0xc0] sm:$0xff] }
  0xc3   :  { %2472 = vst [vmem:[#allocation39_spill] sm:$0xff] %v1937_v49  ;;  %2473 = vst [vmem:[#allocation40_spill] sm:$0xff] %v1940_v56  ;;  %v628_v1 = vmul.f32 %v596_v51, %v1809_v12  ;;  %v599_v4 = vsub.f32 %v535_v44, %v567_v45  ;;  %v571_v10 = vld [vmem:[#allocation15 + $0xc0] sm:$0xff]  ;;  %v1952_v11 = vadd.f32 %v626_v58, %v1891_v19  ;;  %v572_v17 = vld [vmem:[#allocation15 + $0xc8] sm:$0xff]  ;;  %vm195_vm4 = vsmask.f32 1280  ;;  %p1431_p13 = por %p1430_p12, %p1429_p11 }
  0xc4   :  { %2474 = vst [vmem:[#allocation41_spill] sm:$0xff] %v1942_v57  ;;  %687 = vst [vmem:[#allocation21 + $0x60] sm:$0xff] %v1937_v49  ;;  %v629_v13 = vmul.f32 %v597_v60, %v1809_v12  ;;  %v600_v14 = vsub.f32 %v536_v52, %v568_v54  ;;  %v601_v15 = vsub.f32 %v537_v55, %v569_v62  ;;  %v540_v16 = vld [vmem:[#allocation9 + $0xc8] sm:$0xff]  ;;  %v541_v18 = vld [vmem:[#allocation9 + $0xd0] sm:$0xff]  ;;  %vm1979_vm5 = vcmp.lt.s32.totalorder %v155_v0, 256 }
  0xc5   :  { %688 = vst [vmem:[#allocation21 + $0x68] sm:$0xff] %v1940_v56  ;;  %689 = vst [vmem:[#allocation21 + $0x70] sm:$0xff] %v1942_v57  ;;  %v1955_v20 = vadd.f32 %v627_v59, %v563_v26  ;;  %v1957_v22 = vadd.f32 %v628_v1, %v564_v28  ;;  %v630_v24 = vmul.f32 %v598_v2, %v1809_v12  ;;  %v573_v27 = vld [vmem:[#allocation15 + $0xd0] sm:$0xff]  ;;  %v574_v33 = vld [vmem:[#allocation15 + $0xd8] sm:$0xff]  ;;  %p1432_p0 = pnand %p1431_p13, %p1425_p10 }
  0xc6   :  { %2475 = vst [vmem:[#allocation42_spill] sm:$0xff] %v1952_v11  ;;  %v631_v25 = vmul.f32 %v599_v4, %v1809_v12  ;;  %v542_v19 = vld [vmem:[#allocation9 + $0xd8] sm:$0xff]  ;;  %690 = vst [vmem:[#allocation21 + $0x78] sm:$0xff] %v1952_v11  ;;  %v1962_v34 = vadd.f32 %v629_v13, %v565_v36  ;;  %v632_v35 = vmul.f32 %v600_v14, %v1809_v12  ;;  %v543_v26 = vld [vmem:[#allocation9 + $0xe0] sm:$0xff] }
  0xc7   :  { %2476 = vst [vmem:[#allocation43_spill] sm:$0xff] %v1955_v20  ;;  %2477 = vst [vmem:[#allocation44_spill] sm:$0xff] %v1957_v22  ;;  %v633_v37 = vmul.f32 %v601_v15, %v1809_v12  ;;  %v602_v40 = vsub.f32 %v538_v63, %v570_v8  ;;  %v575_v41 = vld [vmem:[#allocation15 + $0xe0] sm:$0xff]  ;;  %v1968_v42 = vadd.f32 %v630_v24, %v566_v43  ;;  %v576_v36 = vld [vmem:[#allocation15 + $0xe8] sm:$0xff] }
  0xc8   :  { %2478 = vst [vmem:[#allocation45_spill] sm:$0xff] %v1962_v34  ;;  %v544_v28 = vld [vmem:[#allocation9 + $0xe8] sm:$0xff]  ;;  %691 = vst [vmem:[#allocation21 + $0x80] sm:$0xff] %v1955_v20  ;;  %v1970_v44 = vadd.f32 %v631_v25, %v567_v45  ;;  %v603_v50 = vsub.f32 %v539_v9, %v571_v10  ;;  %v604_v51 = vsub.f32 %v540_v16, %v572_v17  ;;  %v545_v52 = vld [vmem:[#allocation9 + $0xf0] sm:$0xff] }
  0xc9   :  { %692 = vst [vmem:[#allocation21 + $0x88] sm:$0xff] %v1957_v22  ;;  %2479 = vst [vmem:[#allocation46_spill] sm:$0xff] %v1968_v42  ;;  %v577_v55 = vld [vmem:[#allocation15 + $0xf0] sm:$0xff]  ;;  %v1973_v58 = vadd.f32 %v632_v35, %v568_v54  ;;  %v1975_v60 = vadd.f32 %v633_v37, %v569_v62  ;;  %v634_v63 = vmul.f32 %v602_v40, %v1809_v12  ;;  %v578_v4 = vld [vmem:[#allocation15 + $0xf8] sm:$0xff] }
  0xca   :  { %2480 = vst [vmem:[#allocation47_spill] sm:$0xff] %v1970_v44  ;;  %693 = vst [vmem:[#allocation21 + $0x90] sm:$0xff] %v1962_v34  ;;  %v605_v59 = vsub.f32 %v541_v18, %v573_v27  ;;  %v546_v1 = vld [vmem:[#allocation9 + $0xf8] sm:$0xff]  ;;  %v635_v45 = vmul.f32 %v603_v50, %v1809_v12  ;;  %v636_v54 = vmul.f32 %v604_v51, %v1809_v12  ;;  %v150_v13 = vld [vmem:[#allocation11] sm:$0x3] }
  0xcb   :  { %2481 = vst [vmem:[#allocation48_spill] sm:$0xff] %v1973_v58  ;;  %2482 = vst [vmem:[#allocation49_spill] sm:$0xff] %v1975_v60  ;;  %v606_v2 = vsub.f32 %v542_v19, %v574_v33  ;;  %v607_v62 = vsub.f32 %v543_v26, %v575_v41  ;;  %v149_v9 = vld [vmem:[#allocation3] sm:$0x3]  ;;  %v1989_v0 = vadd.f32 %v634_v63, %v570_v8  ;;  %v211_v18 = vld [vmem:[#allocation8] sm:$0xff] }
  0xcc   :  { %694 = vst [vmem:[#allocation21 + $0x98] sm:$0xff] %v1968_v42  ;;  %695 = vst [vmem:[#allocation21 + $0xa0] sm:$0xff] %v1970_v44  ;;  %v637_v14 = vmul.f32 %v605_v59, %v1809_v12  ;;  %v608_v15 = vsub.f32 %v544_v28, %v576_v36  ;;  %v609_v16 = vsub.f32 %v545_v52, %v577_v55  ;;  %v243_v24 = vld [vmem:[#allocation14] sm:$0xff]  ;;  %v244_v26 = vld [vmem:[#allocation14 + $0x8] sm:$0xff] }
  0xcd   :  { %696 = vst [vmem:[#allocation21 + $0xa8] sm:$0xff] %v1973_v58  ;;  %697 = vst [vmem:[#allocation21 + $0xb0] sm:$0xff] %v1975_v60  ;;  %v212_v25 = vld [vmem:[#allocation8 + $0x8] sm:$0xff]  ;;  %v1992_v35 = vadd.f32 %v635_v45, %v571_v10  ;;  %v1994_v19 = vadd.f32 %v636_v54, %v572_v17  ;;  %v638_v37 = vmul.f32 %v606_v2, %v1809_v12  ;;  %v213_v50 = vld [vmem:[#allocation8 + $0x10] sm:$0xff] }
  0xce   :  { %2485 = vst [vmem:[#allocation50_spill] sm:$0xff] %v1989_v0  ;;  %v639_v40 = vmul.f32 %v607_v62, %v1809_v12  ;;  %v1998_v51 = vld [vmem:[#allocation14 + $0x10] sm:$0xff]  ;;  %698 = vst [vmem:[#allocation21 + $0xb8] sm:$0xff] %v1989_v0  ;;  %v2001_v8 = vadd.f32 %v637_v14, %v573_v27  ;;  %v640_v28 = vmul.f32 %v608_v15, %v1809_v12  ;;  %v246_v17 = vld [vmem:[#allocation14 + $0x18] sm:$0xff] }
  0xcf   :  { %2486 = vst [vmem:[#allocation51_spill] sm:$0xff] %v1992_v35  ;;  %2487 = vst [vmem:[#allocation52_spill] sm:$0xff] %v1994_v19  ;;  %v641_v52 = vmul.f32 %v609_v16, %v1809_v12  ;;  %v610_v10 = vsub.f32 %v546_v1, %v578_v4  ;;  %v214_v63 = vld [vmem:[#allocation8 + $0x18] sm:$0xff]  ;;  %v215_v59 = vld [vmem:[#allocation8 + $0x20] sm:$0xff]  ;;  %v2007_v45 = vadd.f32 %v638_v37, %v574_v33 }
  0xd0   :  { %2488 = vst [vmem:[#allocation53_spill] sm:$0xff] %v2001_v8  ;;  %699 = vst [vmem:[#allocation21 + $0xc0] sm:$0xff] %v1992_v35  ;;  %v2009_v54 = vadd.f32 %v639_v40, %v575_v41  ;;  %v151_v2 = vsub.f32 %v149_v9, %v150_v13  ;;  %v275_v62 = vsub.f32 %v211_v18, %v243_v24  ;;  %v2011_v27 = vld [vmem:[#allocation14 + $0x20] sm:$0xff]  ;;  %v2013_v15 = vld [vmem:[#allocation14 + $0x28] sm:$0xff] }
  0xd1   :  { %700 = vst [vmem:[#allocation21 + $0xc8] sm:$0xff] %v1994_v19  ;;  %2489 = vst [vmem:[#allocation54_spill] sm:$0xff] %v2007_v45  ;;  %v216_v14 = vld [vmem:[#allocation8 + $0x28] sm:$0xff]  ;;  %v2016_v1 = vadd.f32 %v640_v28, %v576_v36  ;;  %v2018_v16 = vadd.f32 %v641_v52, %v577_v55  ;;  %v642_v33 = vmul.f32 %v610_v10, %v1809_v12  ;;  %v2032_v40 = vld [vmem:[#allocation14 + $0x30] sm:$0xff] }
  0xd2   :  { %2490 = vst [vmem:[#allocation55_spill] sm:$0xff] %v2009_v54  ;;  %701 = vst [vmem:[#allocation21 + $0xd0] sm:$0xff] %v2001_v8  ;;  %v276_v37 = vsub.f32 %v212_v25, %v244_v26  ;;  %v153_v41 = vmul.f32 %v1809_v12, %v151_v2  ;;  %v307_v36 = vmul.f32 %v275_v62, %v1809_v12  ;;  %v217_v25 = vld [vmem:[#allocation8 + $0x30] sm:$0xff]  ;;  %v2041_v30 = vld [vmem:[#allocation8 + $0x38] sm:$0xff] }
  0xd3   :  { %2491 = vst [vmem:[#allocation56_spill] sm:$0xff] %v2016_v1  ;;  %2492 = vst [vmem:[#allocation57_spill] sm:$0xff] %v2018_v16  ;;  %v277_v55 = vsub.f32 %v213_v50, %v1998_v51  ;;  %v278_v18 = vsub.f32 %v214_v63, %v246_v17  ;;  %v2036_v28 = vadd.f32 %v642_v33, %v578_v4  ;;  %v2043_v62 = vld [vmem:[#allocation14 + $0x38] sm:$0xff] }
  0xd4   :  { %702 = vst [vmem:[#allocation21 + $0xd8] sm:$0xff] %v2007_v45  ;;  %703 = vst [vmem:[#allocation21 + $0xe0] sm:$0xff] %v2009_v54  ;;  %v308_v52 = vmul.f32 %v276_v37, %v1809_v12  ;;  %v279_v10 = vsub.f32 %v215_v59, %v2011_v27  ;;  %v280_v2 = vsub.f32 %v216_v14, %v2013_v15  ;;  %v2045_v50 = vld [vmem:[#allocation8 + $0x40] sm:$0xff]  ;;  %v2055_v59 = vld [vmem:[#allocation8 + $0x48] sm:$0xff] }
  0xd5   :  { %vm2026_vm6 = vmand %vm194_vm3, %vm195_vm4  ;;  %704 = vst [vmem:[#allocation21 + $0xe8] sm:$0xff] %v2016_v1  ;;  %v154_v63 = vadd.f32 %v153_v41, %v150_v13  ;;  %v2049_v23 = vadd.f32 %v307_v36, %v243_v24  ;;  %v309_v4 = vmul.f32 %v277_v55, %v1809_v12  ;;  %v310_v33 = vmul.f32 %v278_v18, %v1809_v12  ;;  %v2053_v37 = vld [vmem:[#allocation14 + $0x40] sm:$0xff]  ;;  %v2057_v14 = vld [vmem:[#allocation14 + $0x48] sm:$0xff] }
  0xd6   :  { %705 = vst [vmem:[#allocation21 + $0xf0] sm:$0xff] %v2018_v16  ;;  %2495 = vst [vmem:[#allocation58_spill] sm:$0xff] %v2036_v28  ;;  %v2062_v16 = vadd.f32 %v308_v52, %v244_v26  ;;  %v311_v13 = vmul.f32 %v279_v10, %v1809_v12  ;;  %v312_v24 = vmul.f32 %v280_v2, %v1809_v12  ;;  %v2067_v36 = vld [vmem:[#allocation8 + $0x50] sm:$0xff]  ;;  %v2071_v18 = vld [vmem:[#allocation8 + $0x58] sm:$0xff]  ;;  %v2496_v26 = vsub.s32 0, %v1803_v3 }
  0xd7   :  { %706 = vst [vmem:[#allocation21 + $0xf8] sm:$0xff] %v2036_v28  ;;  %v281_v41 = vsub.f32 %v217_v25, %v2032_v40  ;;  %v2069_v55 = vld [vmem:[#allocation14 + $0x50] sm:$0xff]  ;;  %159 = vst.msk [vmem:[#allocation17] sm:$0x3] %vm1979_vm5, %v154_v63  ;;  %v2497_v10 = vsub.s32 1, %v1803_v3  ;;  %v2081_v2 = vadd.f32 %v309_v4, %v1998_v51  ;;  %v2083_v25 = vadd.f32 %v310_v33, %v246_v17  ;;  %v2085_v1 = vld [vmem:[#allocation14 + $0x58] sm:$0xff] }
  0xd8   :  { %v164_v52 = vrot.slane %v154_v63, %v2496_v26  ;;  %371 = vst [vmem:[#allocation20] sm:$0xff] %v2049_v23  ;;  %v2087_v54 = vld [vmem:[#allocation8 + $0x60] sm:$0xff] }
  0xd9   :  { %v168_v28 = vrot.slane %v154_v63, %v2497_v10  ;;  %v2089_v45 = vld [vmem:[#allocation14 + $0x60] sm:$0xff] }
  0xda   :  { %1435 = shalt.err (!%p1432_p0)
}
  0xdb   :  { %s1436_s19 = scalar_lea.hbm %s2443_s12, 4096 }
  0xdc   :  { %p1437_p1 = scmp.ne.s32.totalorder %s2443_s12, %s1436_s19  ;;  %p1440_p2 = scmp.lt.u32.totalorder %s1436_s19, %s2443_s12 }
  0xde   :  { %p1442_p3 = pnand %p1440_p2, %p1437_p1 }
  0xe0   :  { %1445 = shalt.err (!%p1442_p3)
}
  0xe1   :  { %910 = dma.vmem_to_hbm [thread:$0]  %s2047_s20, 4096, %s2443_s12, [#allocation22], %s1578_s2, %s1578_s2, %s1579_s22   ;;  %372 = vst [vmem:[#allocation20 + $0x8] sm:$0xff] %v2062_v16  ;;  %v2113_v3 = vadd.f32 %v311_v13, %v2011_v27  ;;  %v2116_v43 = vadd.f32 %v312_v24, %v2013_v15  ;;  %v313_v51 = vmul.f32 %v281_v41, %v1809_v12  ;;  %v282_v17 = vsub.f32 %v2041_v30, %v2043_v62 }
  0xe2   :  { %s1446_s18 = scalar_lea.vmem %s2059_s26, 32  ;;  %p1451_p5 = scmp.lt.s32.totalorder %s2059_s26, %s2059_s26 }
  0xe3   :  { %p1447_p4 = scmp.ne.s32.totalorder %s2059_s26, %s1446_s18  ;;  %p1452_p6 = scmp.lt.s32.totalorder %s1446_s18, %s1446_s18 }
  0xe5   :  { %p1453_p7 = por %p1452_p6, %p1451_p5 }
  0xe7   :  { %p1454_p8 = pnand %p1453_p7, %p1447_p4 }
  0xe9   :  { %1457 = shalt.err (!%p1454_p8)
}
  0xea   :  { %s1458_s5 = scalar_lea.hbm %s2440_s9, 32 }
  0xeb   :  { %p1459_p9 = scmp.ne.s32.totalorder %s2440_s9, %s1458_s5  ;;  %p1462_p10 = scmp.lt.u32.totalorder %s1458_s5, %s2440_s9 }
  0xed   :  { %p1464_p11 = pnand %p1462_p10, %p1459_p9 }
  0xef   :  { %1467 = shalt.err (!%p1464_p11)
}
  0xf0   :  { %876 = dma.vmem_to_hbm [thread:$0]  %s2059_s26, 32, %s2440_s9, [#allocation5]   ;;  %v989_v30 = vpack.c.bf16 %v168_v28, %v164_v52  ;;  %vm197_vm7 = vmor %vm2026_vm6, %vm1805_vm2  ;;  %373 = vst [vmem:[#allocation20 + $0x10] sm:$0xff] %v2081_v2  ;;  %v283_v27 = vsub.f32 %v2045_v50, %v2053_v37  ;;  %v284_v15 = vsub.f32 %v2055_v59, %v2057_v14  ;;  %v285_v63 = vsub.f32 %v2067_v36, %v2069_v55  ;;  %v224_v4 = vld [vmem:[#allocation8 + $0x68] sm:$0xff]  ;;  %v225_v41 = vld [vmem:[#allocation8 + $0x70] sm:$0xff] }
  0xf1   :  { %374 = vst [vmem:[#allocation20 + $0x18] sm:$0xff] %v2083_v25  ;;  %v256_v28 = vld [vmem:[#allocation14 + $0x68] sm:$0xff]  ;;  %v198_v33 = vld [vmem:[#allocation23] sm:$0x3]  ;;  %375 = vst [vmem:[#allocation20 + $0x20] sm:$0xff] %v2113_v3  ;;  %v2153_v13 = vadd.f32 %v313_v51, %v2032_v40  ;;  %v314_v24 = vmul.f32 %v282_v17, %v1809_v12  ;;  %v286_v50 = vsub.f32 %v2071_v18, %v2085_v1  ;;  %s1593_s9 = smov [#allocation23]  }
  0xf2   :  { %376 = vst [vmem:[#allocation20 + $0x28] sm:$0xff] %v2116_v43  ;;  %v287_v59 = vsub.f32 %v2087_v54, %v2089_v45  ;;  %v2160_v36 = vld [vmem:[#allocation14 + $0x70] sm:$0xff]  ;;  %v182_v52 = vrot.slane %v989_v30, %v1816_v31  ;;  %v315_v10 = vmul.f32 %v283_v27, %v1809_v12  ;;  %v316_v8 = vmul.f32 %v284_v15, %v1809_v12  ;;  %v2166_v51 = vld [vmem:[#allocation14 + $0x78] sm:$0xff]  ;;  %v2168_v19 = vld [vmem:[#allocation14 + $0x80] sm:$0xff]  ;;  %s917_s4 = sshll.u32 %s1593_s9, 4  ;;  %s2203_s4 = int_to_ptr.vmem [resolvable:$true] %s917_s4 }
  0xf3   :  { %v226_v26 = vld [vmem:[#allocation8 + $0x78] sm:$0xff]  ;;  %v317_v40 = vmul.f32 %v285_v63, %v1809_v12  ;;  %v227_v17 = vld [vmem:[#allocation8 + $0x80] sm:$0xff]  ;;  %377 = vst [vmem:[#allocation20 + $0x30] sm:$0xff] %v2153_v13  ;;  %v2172_v54 = vadd.f32 %v314_v24, %v2043_v62  ;;  %v318_v18 = vmul.f32 %v286_v50, %v1809_v12  ;;  %v288_v27 = vsub.f32 %v224_v4, %v256_v28  ;;  %v228_v15 = vld [vmem:[#allocation8 + $0x88] sm:$0xff]  ;;  %s1468_s26 = scalar_lea.vmem %s2203_s4, 32  ;;  %p1473_p13 = scmp.lt.s32.totalorder %s2203_s4, %s2203_s4 }
  0xf4   :  { %v319_v30 = vmul.f32 %v287_v59, %v1809_v12  ;;  %v2176_v35 = vld [vmem:[#allocation14 + $0x88] sm:$0xff]  ;;  %v189_v0 = vrot.slane %v182_v52, %v1816_v31  ;;  %v2180_v60 = vadd.f32 %v315_v10, %v2053_v37  ;;  %v2183_v58 = vadd.f32 %v316_v8, %v2057_v14  ;;  %v2188_v24 = vld [vmem:[#allocation14 + $0x90] sm:$0xff]  ;;  %v2190_v59 = vld [vmem:[#allocation14 + $0x98] sm:$0xff]  ;;  %p1469_p12 = scmp.ne.s32.totalorder %s2203_s4, %s1468_s26  ;;  %p1474_p0 = scmp.lt.s32.totalorder %s1468_s26, %s1468_s26 }
  0xf5   :  { %v229_v63 = vld [vmem:[#allocation8 + $0x90] sm:$0xff]  ;;  %v2186_v62 = vadd.f32 %v317_v40, %v2069_v55  ;;  %v230_v50 = vld [vmem:[#allocation8 + $0x98] sm:$0xff]  ;;  %378 = vst [vmem:[#allocation20 + $0x38] sm:$0xff] %v2172_v54  ;;  %v2194_v4 = vadd.f32 %v318_v18, %v2085_v1  ;;  %v320_v37 = vmul.f32 %v288_v27, %v1809_v12  ;;  %v289_v8 = vsub.f32 %v225_v41, %v2160_v36  ;;  %v231_v14 = vld [vmem:[#allocation8 + $0xa0] sm:$0xff] }
  0xf6   :  { %v2197_v31 = vadd.f32 %v319_v30, %v2089_v45  ;;  %v2201_v55 = vld [vmem:[#allocation14 + $0xa0] sm:$0xff]  ;;  %v199_v52 = vsel %vm197_vm7, %v189_v0, %v198_v33  ;;  %379 = vst [vmem:[#allocation20 + $0x40] sm:$0xff] %v2180_v60  ;;  %380 = vst [vmem:[#allocation20 + $0x48] sm:$0xff] %v2183_v58  ;;  %v290_v45 = vsub.f32 %v226_v26, %v2166_v51  ;;  %v2216_v40 = vld [vmem:[#allocation14 + $0xa8] sm:$0xff]  ;;  %p1475_p1 = por %p1474_p0, %p1473_p13 }
  0xf7   :  { %381 = vst [vmem:[#allocation20 + $0x50] sm:$0xff] %v2186_v62  ;;  %v291_v1 = vsub.f32 %v227_v17, %v2168_v19  ;;  %v292_v41 = vsub.f32 %v228_v15, %v2176_v35  ;;  %v232_v10 = vld [vmem:[#allocation8 + $0xa8] sm:$0xff]  ;;  %200 = vst [vmem:[#allocation23] sm:$0x3] %v199_v52  ;;  %v2220_v6 = vadd.f32 %v320_v37, %v256_v28  ;;  %v233_v26 = vld [vmem:[#allocation8 + $0xb0] sm:$0xff] }
  0xf8   :  { %382 = vst [vmem:[#allocation20 + $0x58] sm:$0xff] %v2194_v4  ;;  %383 = vst [vmem:[#allocation20 + $0x60] sm:$0xff] %v2197_v31  ;;  %v321_v0 = vmul.f32 %v289_v8, %v1809_v12  ;;  %v293_v9 = vsub.f32 %v229_v63, %v2188_v24  ;;  %v294_v33 = vsub.f32 %v230_v50, %v2190_v59  ;;  %v2225_v17 = vld [vmem:[#allocation14 + $0xb0] sm:$0xff]  ;;  %v2231_v37 = vld [vmem:[#allocation14 + $0xb8] sm:$0xff]  ;;  %p1476_p2 = pnand %p1475_p1, %p1469_p12 }
  0xf9   :  { %v234_v18 = vld [vmem:[#allocation8 + $0xb8] sm:$0xff]  ;;  %v322_v30 = vmul.f32 %v290_v45, %v1809_v12  ;;  %v323_v27 = vmul.f32 %v291_v1, %v1809_v12  ;;  %v324_v15 = vmul.f32 %v292_v41, %v1809_v12  ;;  %v295_v28 = vsub.f32 %v231_v14, %v2201_v55  ;;  %v235_v52 = vld [vmem:[#allocation8 + $0xc0] sm:$0xff] }
  0xfa   :  { %v2233_v8 = vld [vmem:[#allocation14 + $0xc0] sm:$0xff] }
  0xfb   :  { %1479 = shalt.err (!%p1476_p2)
}
  0xfc   :  { %s1480_s29 = scalar_lea.hbm %s2444_s13, 32 }
  0xfd   :  { %p1481_p3 = scmp.ne.s32.totalorder %s2444_s13, %s1480_s29  ;;  %p1484_p4 = scmp.lt.u32.totalorder %s1480_s29, %s2444_s13 }
  0xff   :  { %p1486_p5 = pnand %p1484_p4, %p1481_p3 }
 0x101   :  { %1489 = shalt.err (!%p1486_p5)
}
 0x102   :  { %920 = dma.vmem_to_hbm [thread:$0]  %s2203_s4, 32, %s2444_s13, [#allocation22]   ;;  %384 = vst [vmem:[#allocation20 + $0x68] sm:$0xff] %v2220_v6  ;;  %v2254_v63 = vadd.f32 %v321_v0, %v2160_v36  ;;  %v325_v50 = vmul.f32 %v293_v9, %v1809_v12  ;;  %v326_v14 = vmul.f32 %v294_v33, %v1809_v12  ;;  %v296_v45 = vsub.f32 %v232_v10, %v2216_v40  ;;  %v236_v1 = vld [vmem:[#allocation8 + $0xc8] sm:$0xff]  ;;  %v237_v44 = vld [vmem:[#allocation8 + $0xd0] sm:$0xff]  ;;  %v238_v9 = vld [vmem:[#allocation8 + $0xd8] sm:$0xff] }
 0x103   :  { %v268_v41 = vld [vmem:[#allocation14 + $0xc8] sm:$0xff]  ;;  %v2260_v42 = vadd.f32 %v322_v30, %v2166_v51  ;;  %v2263_v34 = vadd.f32 %v323_v27, %v2168_v19  ;;  %v2266_v22 = vadd.f32 %v324_v15, %v2176_v35  ;;  %v327_v36 = vmul.f32 %v295_v28, %v1809_v12  ;;  %v269_v0 = vld [vmem:[#allocation14 + $0xd0] sm:$0xff]  ;;  %v270_v20 = vld [vmem:[#allocation14 + $0xd8] sm:$0xff]  ;;  %s1594_s13 = smov [#allocation20]   ;;  %s1595_s18 = smov [#allocation26]  }
 0x104   :  { %385 = vst [vmem:[#allocation20 + $0x70] sm:$0xff] %v2254_v63  ;;  %v2271_v10 = vadd.f32 %v325_v50, %v2188_v24  ;;  %v2274_v33 = vadd.f32 %v326_v14, %v2190_v59  ;;  %v328_v51 = vmul.f32 %v296_v45, %v1809_v12  ;;  %v297_v19 = vsub.f32 %v233_v26, %v2225_v17  ;;  %v239_v30 = vld [vmem:[#allocation8 + $0xe0] sm:$0xff]  ;;  %v240_v28 = vld [vmem:[#allocation8 + $0xe8] sm:$0xff]  ;;  %v273_v57 = vld [vmem:[#allocation14 + $0xf0] sm:$0xff]  ;;  %s892_s17 = sshll.u32 %s1594_s13, 4  ;;  %s936_s12 = sshll.u32 %s1595_s18, 4  ;;  %s2335_s17 = int_to_ptr.vmem [resolvable:$true] %s892_s17  ;;  %s2348_s12 = int_to_ptr.vmem [resolvable:$true] %s936_s12 }
 0x105   :  { %v271_v35 = vld [vmem:[#allocation14 + $0xe0] sm:$0xff]  ;;  %386 = vst [vmem:[#allocation20 + $0x78] sm:$0xff] %v2260_v42  ;;  %387 = vst [vmem:[#allocation20 + $0x80] sm:$0xff] %v2263_v34  ;;  %v2282_v27 = vadd.f32 %v327_v36, %v2201_v55  ;;  %v298_v24 = vsub.f32 %v234_v18, %v2231_v37  ;;  %v299_v59 = vsub.f32 %v235_v52, %v2233_v8  ;;  %v272_v50 = vld [vmem:[#allocation14 + $0xe8] sm:$0xff]  ;;  %s1596_s8 = smov [#allocation27]   ;;  %s1490_s6 = scalar_lea.vmem %s2335_s17, 4096 }
 0x106   :  { %388 = vst [vmem:[#allocation20 + $0x88] sm:$0xff] %v2266_v22  ;;  %v300_v15 = vsub.f32 %v236_v1, %v268_v41  ;;  %389 = vst [vmem:[#allocation20 + $0x90] sm:$0xff] %v2271_v10  ;;  %v2289_v26 = vadd.f32 %v328_v51, %v2216_v40  ;;  %v329_v14 = vmul.f32 %v297_v19, %v1809_v12  ;;  %v241_v36 = vld [vmem:[#allocation8 + $0xf0] sm:$0xff]  ;;  %v242_v19 = vld [vmem:[#allocation8 + $0xf8] sm:$0xff]  ;;  %s948_s5 = sshll.u32 %s1596_s8, 4  ;;  %p1491_p6 = scmp.ne.s32.totalorder %s2335_s17, %s1490_s6  ;;  %s2350_s5 = int_to_ptr.vmem [resolvable:$true] %s948_s5 }
 0x107   :  { %390 = vst [vmem:[#allocation20 + $0x98] sm:$0xff] %v2274_v33  ;;  %v301_v45 = vsub.f32 %v237_v44, %v269_v0  ;;  %v302_v11 = vsub.f32 %v238_v9, %v270_v20  ;;  %391 = vst [vmem:[#allocation20 + $0xa0] sm:$0xff] %v2282_v27  ;;  %v330_v55 = vmul.f32 %v298_v24, %v1809_v12  ;;  %v274_v56 = vld [vmem:[#allocation14 + $0xf8] sm:$0xff]  ;;  %p1495_p7 = scmp.lt.s32.totalorder %s2335_s17, %s2335_s17  ;;  %p1496_p8 = scmp.lt.s32.totalorder %s1490_s6, %s1490_s6 }
 0x108   :  { %v331_v18 = vmul.f32 %v299_v59, %v1809_v12  ;;  %v332_v52 = vmul.f32 %v300_v15, %v1809_v12  ;;  %v303_v1 = vsub.f32 %v239_v30, %v271_v35  ;;  %392 = vst [vmem:[#allocation20 + $0xa8] sm:$0xff] %v2289_v26  ;;  %v2298_v40 = vadd.f32 %v329_v14, %v2225_v17 }
 0x109   :  { %v333_v51 = vmul.f32 %v301_v45, %v1809_v12  ;;  %v334_v44 = vmul.f32 %v302_v11, %v1809_v12  ;;  %v304_v9 = vsub.f32 %v240_v28, %v272_v50  ;;  %v362_v24 = vadd.f32 %v330_v55, %v2231_v37  ;;  %p1497_p9 = por %p1496_p8, %p1495_p7 }
 0x10a   :  { %v363_v59 = vadd.f32 %v331_v18, %v2233_v8  ;;  %v364_v15 = vadd.f32 %v332_v52, %v268_v41  ;;  %v335_v30 = vmul.f32 %v303_v1, %v1809_v12  ;;  %393 = vst [vmem:[#allocation20 + $0xb0] sm:$0xff] %v2298_v40  ;;  %v305_v45 = vsub.f32 %v241_v36, %v273_v57 }
 0x10b   :  { %v2306_v49 = vadd.f32 %v333_v51, %v269_v0  ;;  %v366_v17 = vadd.f32 %v334_v44, %v270_v20  ;;  %v336_v14 = vmul.f32 %v304_v9, %v1809_v12  ;;  %394 = vst [vmem:[#allocation20 + $0xb8] sm:$0xff] %v362_v24  ;;  %v306_v28 = vsub.f32 %v242_v19, %v274_v56  ;;  %p1498_p10 = pnand %p1497_p9, %p1491_p6 }
 0x10c   :  { %395 = vst [vmem:[#allocation20 + $0xc0] sm:$0xff] %v363_v59  ;;  %396 = vst [vmem:[#allocation20 + $0xc8] sm:$0xff] %v364_v15  ;;  %v367_v11 = vadd.f32 %v335_v30, %v271_v35  ;;  %v1038_v37 = vpack.c.bf16 %v2062_v16, %v2049_v23  ;;  %v1039_v8 = vpack.c.bf16 %v2083_v25, %v2081_v2 }
 0x10d   :  { %397 = vst [vmem:[#allocation20 + $0xd0] sm:$0xff] %v2306_v49  ;;  %398 = vst [vmem:[#allocation20 + $0xd8] sm:$0xff] %v366_v17  ;;  %v368_v41 = vadd.f32 %v336_v14, %v272_v50  ;;  %v337_v20 = vmul.f32 %v305_v45, %v1809_v12  ;;  %v1040_v0 = vpack.c.bf16 %v2116_v43, %v2113_v3 }
 0x10e   :  { %v1041_v55 = vpack.c.bf16 %v2172_v54, %v2153_v13  ;;  %399 = vst [vmem:[#allocation20 + $0xe0] sm:$0xff] %v367_v11  ;;  %v338_v23 = vmul.f32 %v306_v28, %v1809_v12  ;;  %499 = vst [vmem:[#allocation26] sm:$0xff] %v1038_v37  ;;  %v1042_v16 = vpack.c.bf16 %v2183_v58, %v2180_v60 }
 0x10f   :  { %500 = vst [vmem:[#allocation26 + $0x8] sm:$0xff] %v1039_v8  ;;  %v1043_v2 = vpack.c.bf16 %v2194_v4, %v2186_v62  ;;  %v1044_v25 = vpack.c.bf16 %v2220_v6, %v2197_v31  ;;  %400 = vst [vmem:[#allocation20 + $0xe8] sm:$0xff] %v368_v41  ;;  %v369_v3 = vadd.f32 %v337_v20, %v273_v57  ;;  %v2501_v31 = vld [vmem:[#allocation42_spill] sm:$0xff]  ;;  %v2503_v6 = vld [vmem:[#allocation44_spill] sm:$0xff] }
 0x110   :  { %501 = vst [vmem:[#allocation26 + $0x10] sm:$0xff] %v1040_v0  ;;  %502 = vst [vmem:[#allocation26 + $0x18] sm:$0xff] %v1041_v55  ;;  %v1045_v43 = vpack.c.bf16 %v2260_v42, %v2254_v63  ;;  %v1046_v12 = vpack.c.bf16 %v2266_v22, %v2263_v34  ;;  %v1047_v13 = vpack.c.bf16 %v2274_v33, %v2271_v10 }
 0x111   :  { %v370_v58 = vadd.f32 %v338_v23, %v274_v56  ;;  %503 = vst [vmem:[#allocation26 + $0x20] sm:$0xff] %v1042_v16  ;;  %504 = vst [vmem:[#allocation26 + $0x28] sm:$0xff] %v1043_v2  ;;  %v1048_v57 = vpack.c.bf16 %v2289_v26, %v2282_v27  ;;  %v1049_v60 = vpack.c.bf16 %v362_v24, %v2298_v40 }
 0x112   :  { %505 = vst [vmem:[#allocation26 + $0x30] sm:$0xff] %v1044_v25  ;;  %v1050_v42 = vpack.c.bf16 %v364_v15, %v363_v59  ;;  %401 = vst [vmem:[#allocation20 + $0xf0] sm:$0xff] %v369_v3  ;;  %v1051_v22 = vpack.c.bf16 %v366_v17, %v2306_v49  ;;  %v1052_v34 = vpack.c.bf16 %v368_v41, %v367_v11 }
 0x113   :  { %506 = vst [vmem:[#allocation26 + $0x38] sm:$0xff] %v1045_v43  ;;  %507 = vst [vmem:[#allocation26 + $0x40] sm:$0xff] %v1046_v12  ;;  %v1089_v56 = vpack.c.bf16 %v1829_v47, %v1822_v39  ;;  %v1094_v54 = vpack.c.bf16 %v1841_v53, %v1831_v48  ;;  %v1053_v62 = vpack.c.bf16 %v370_v58, %v369_v3  ;;  %v2498_v48 = vld [vmem:[#allocation39_spill] sm:$0xff]  ;;  %v2499_v53 = vld [vmem:[#allocation40_spill] sm:$0xff] }
 0x114   :  { %508 = vst [vmem:[#allocation26 + $0x48] sm:$0xff] %v1047_v13  ;;  %402 = vst [vmem:[#allocation20 + $0xf8] sm:$0xff] %v370_v58  ;;  %v1099_v4 = vpack.c.bf16 %v1879_v5, %v1874_v61  ;;  %v1104_v49 = vpack.c.bf16 %v1914_v21, %v1881_v7  ;;  %v1109_v39 = vpack.c.bf16 %v1921_v32, %v1918_v29  ;;  %v2500_v5 = vld [vmem:[#allocation41_spill] sm:$0xff]  ;;  %v2502_v21 = vld [vmem:[#allocation43_spill] sm:$0xff] }
 0x115   :  { %509 = vst [vmem:[#allocation26 + $0x50] sm:$0xff] %v1048_v57  ;;  %510 = vst [vmem:[#allocation26 + $0x58] sm:$0xff] %v1049_v60  ;;  %v1114_v47 = vpack.c.bf16 %v1935_v46, %v1927_v38  ;;  %v1119_v61 = vpack.c.bf16 %v2499_v53, %v2498_v48  ;;  %v1124_v7 = vpack.c.bf16 %v2501_v31, %v2500_v5 }
 0x116   :  { %511 = vst [vmem:[#allocation26 + $0x60] sm:$0xff] %v1050_v42  ;;  %512 = vst [vmem:[#allocation26 + $0x68] sm:$0xff] %v1051_v22  ;;  %v1129_v29 = vpack.c.bf16 %v2503_v6, %v2502_v21 }
 0x117   :  { %513 = vst [vmem:[#allocation26 + $0x70] sm:$0xff] %v1052_v34  ;;  %1090 = vst [vmem:[#allocation27] sm:$0xff] %v1089_v56  }
 0x118   :  { %1166 = vst [vmem:[#allocation27 + $0x8] sm:$0xff] %v1094_v54  }
 0x119   :  { %1501 = shalt.err (!%p1498_p10)
}
 0x11a   :  { %s1502_s3 = scalar_lea.hbm %s2442_s11, 4096 }
 0x11b   :  { %p1503_p11 = scmp.ne.s32.totalorder %s2442_s11, %s1502_s3  ;;  %p1506_p12 = scmp.lt.u32.totalorder %s1502_s3, %s2442_s11 }
 0x11d   :  { %p1508_p13 = pnand %p1506_p12, %p1503_p11 }
 0x11f   :  { %1511 = shalt.err (!%p1508_p13)
}
 0x120   :  { %898 = dma.vmem_to_hbm [thread:$0]  %s2335_s17, 4096, %s2442_s11, [#allocation19], %s1583_s1, %s1583_s1, %s1584_s21   ;;  %514 = vst [vmem:[#allocation26 + $0x78] sm:$0xff] %v1053_v62  ;;  %1167 = vst [vmem:[#allocation27 + $0x10] sm:$0xff] %v1099_v4   ;;  %v2504_v32 = vld [vmem:[#allocation45_spill] sm:$0xff]  ;;  %v2505_v38 = vld [vmem:[#allocation46_spill] sm:$0xff] }
 0x121   :  { %1168 = vst [vmem:[#allocation27 + $0x18] sm:$0xff] %v1104_v49   ;;  %1169 = vst [vmem:[#allocation27 + $0x20] sm:$0xff] %v1109_v39   ;;  %v1134_v46 = vpack.c.bf16 %v2505_v38, %v2504_v32  ;;  %v2506_v63 = vld [vmem:[#allocation47_spill] sm:$0xff]  ;;  %v2507_v10 = vld [vmem:[#allocation48_spill] sm:$0xff]  ;;  %s1512_s11 = scalar_lea.vmem %s2348_s12, 2048  ;;  %p1517_p1 = scmp.lt.s32.totalorder %s2348_s12, %s2348_s12 }
 0x122   :  { %v1139_v33 = vpack.c.bf16 %v2507_v10, %v2506_v63  ;;  %v2508_v35 = vld [vmem:[#allocation49_spill] sm:$0xff]  ;;  %v2509_v27 = vld [vmem:[#allocation50_spill] sm:$0xff]  ;;  %v2510_v26 = vld [vmem:[#allocation51_spill] sm:$0xff]  ;;  %1170 = vst [vmem:[#allocation27 + $0x28] sm:$0xff] %v1114_v47   ;;  %p1513_p0 = scmp.ne.s32.totalorder %s2348_s12, %s1512_s11  ;;  %p1518_p2 = scmp.lt.s32.totalorder %s1512_s11, %s1512_s11 }
 0x123   :  { %v1144_v50 = vpack.c.bf16 %v2509_v27, %v2508_v35  ;;  %v2511_v18 = vld [vmem:[#allocation52_spill] sm:$0xff]  ;;  %1171 = vst [vmem:[#allocation27 + $0x30] sm:$0xff] %v1119_v61   ;;  %1172 = vst [vmem:[#allocation27 + $0x38] sm:$0xff] %v1124_v7   ;;  %v2512_v1 = vld [vmem:[#allocation53_spill] sm:$0xff] }
 0x124   :  { %v1149_v52 = vpack.c.bf16 %v2511_v18, %v2510_v26  ;;  %1173 = vst [vmem:[#allocation27 + $0x40] sm:$0xff] %v1129_v29   ;;  %v2513_v36 = vld [vmem:[#allocation54_spill] sm:$0xff]  ;;  %v2514_v51 = vld [vmem:[#allocation55_spill] sm:$0xff]  ;;  %v2515_v44 = vld [vmem:[#allocation56_spill] sm:$0xff]  ;;  %p1519_p3 = por %p1518_p2, %p1517_p1 }
 0x125   :  { %v1154_v40 = vpack.c.bf16 %v2513_v36, %v2512_v1  ;;  %v1159_v9 = vpack.c.bf16 %v2515_v44, %v2514_v51  ;;  %v2516_v19 = vld [vmem:[#allocation57_spill] sm:$0xff]  ;;  %v2517_v24 = vld [vmem:[#allocation58_spill] sm:$0xff] }
 0x126   :  { %v1164_v59 = vpack.c.bf16 %v2517_v24, %v2516_v19  ;;  %p1520_p4 = pnand %p1519_p3, %p1513_p0 }
 0x128   :  { %1523 = shalt.err (!%p1520_p4)
}
 0x129   :  { %s1524_s28 = scalar_lea.hbm %s2446_s15, 2048 }
 0x12a   :  { %p1525_p5 = scmp.ne.s32.totalorder %s2446_s15, %s1524_s28  ;;  %p1528_p6 = scmp.lt.u32.totalorder %s1524_s28, %s2446_s15 }
 0x12c   :  { %p1530_p7 = pnand %p1528_p6, %p1525_p5 }
 0x12e   :  { %1533 = shalt.err (!%p1530_p7)
}
 0x12f   :  { %942 = dma.vmem_to_hbm [thread:$0]  %s2348_s12, 2048, %s2446_s15, [#allocation25], %s1578_s2, %s1578_s2, %s1579_s22   ;;  %1174 = vst [vmem:[#allocation27 + $0x48] sm:$0xff] %v1134_v46   ;;  %1175 = vst [vmem:[#allocation27 + $0x50] sm:$0xff] %v1139_v33  }
 0x130   :  { %1176 = vst [vmem:[#allocation27 + $0x58] sm:$0xff] %v1144_v50   ;;  %1177 = vst [vmem:[#allocation27 + $0x60] sm:$0xff] %v1149_v52   ;;  %s1534_s0 = scalar_lea.vmem %s2350_s5, 2048  ;;  %p1539_p9 = scmp.lt.s32.totalorder %s2350_s5, %s2350_s5 }
 0x131   :  { %1178 = vst [vmem:[#allocation27 + $0x68] sm:$0xff] %v1154_v40   ;;  %1179 = vst [vmem:[#allocation27 + $0x70] sm:$0xff] %v1159_v9   ;;  %p1535_p8 = scmp.ne.s32.totalorder %s2350_s5, %s1534_s0  ;;  %p1540_p10 = scmp.lt.s32.totalorder %s1534_s0, %s1534_s0 }
 0x132   :  { %1180 = vst [vmem:[#allocation27 + $0x78] sm:$0xff] %v1164_v59  }
 0x133   :  { %p1541_p11 = por %p1540_p10, %p1539_p9 }
 0x135   :  { %p1542_p12 = pnand %p1541_p11, %p1535_p8 }
 0x137   :  { %1545 = shalt.err (!%p1542_p12)
}
 0x138   :  { %s1546_s18 = scalar_lea.hbm %s2447_s16, 2048 }
 0x139   :  { %p1547_p13 = scmp.ne.s32.totalorder %s2447_s16, %s1546_s18  ;;  %p1550_p0 = scmp.lt.u32.totalorder %s1546_s18, %s2447_s16 }
 0x13b   :  { %p1552_p1 = pnand %p1550_p0, %p1547_p13 }
 0x13d   :  { %1555 = shalt.err (!%p1552_p1)
}
 0x13e   :  { %s1597_s8 = smov 64   ;;  %s1598_s6 = smov 4  }
 0x13f   :  { %954 = dma.vmem_to_hbm [thread:$0]  %s2350_s5, 2048, %s2447_s16, [#allocation28], %s1597_s8, %s1597_s8, %s1598_s6  }
 0x140   :  { %1566 = dma.done.wait [#allocation5], 32  }
 0x141   :  { %1567 = vsyncadd [#allocation5], 4294967264 }
 0x142   :  { %1568 = dma.done.wait [#allocation19], 4112  }
 0x143   :  { %1569 = vsyncadd [#allocation19], 4294963184 }
 0x144   :  { %1570 = dma.done.wait [#allocation22], 4128  }
 0x145   :  { %1571 = vsyncadd [#allocation22], 4294963168 }
 0x146   :  { %1572 = dma.done.wait [#allocation25], 2064  }
 0x147   :  { %1573 = vsyncadd [#allocation25], 4294965232 }
 0x148   :  { %1574 = dma.done.wait [#allocation28], 2048  }
 0x149   :  { %1575 = vsyncadd [#allocation28], 4294965248 }
 0x14a   :  { %979 = vsyncpa [#allocation4], 1 }
 0x14b   :  { %980 = vsyncpa [#allocation7], 1 }
 0x14c   :  { %981 = vsyncpa [#allocation10], 1 }
 0x14d   :  { %982 = vsyncpa [#allocation13], 1 }
 0x14e   :  { %983 = vsyncpa [#allocation16], 1 }
 0x14f   :  { %984 = vsyncpa [#allocation5], 1 }
 0x150   :  { %985 = vsyncpa [#allocation19], 1 }
 0x151   :  { %986 = vsyncpa [#allocation22], 1 }
 0x152   :  { %987 = vsyncpa [#allocation25], 1 }
 0x153   :  { %988 = vsyncpa [#allocation28], 1 }

</bundles_post_ra>
